<compile_context>
chip_gen: v5e
topology: v5e:2x2
jax: 0.10.0
libtpu: 0.0.40
codegen_flags: <defaults>
</compile_context>

<pallas_src>
import jax
import jax.numpy as jnp
from jax.experimental import pallas as pl
from jax.experimental.pallas import tpu as pltpu


# ----------------------------- Pallas kernel ---------------------------------
def _scinterp_kernel(x_ref, v_ref,
                     w0, b0, w1, b1, w2, b2, w3, b3, w4, b4,    # l1 weights
                     w5, b5, w6, b6, w7, b7, w8, b8, w9, b9,    # l2 weights
                     logits_ref, hidden_ref):
    tb, s, d_gpt = x_ref.shape

    # Fused value scaling; v_ref is (TB, S, 1) so the broadcast is a lane splat
    # (no XLU relayout). bf16 embeddings * f32 values -> f32 -> bf16 MXU operand.
    x = x_ref[...].astype(jnp.float32) * v_ref[...]                   # (TB, S, D) f32
    x = x.reshape(tb * s, d_gpt).astype(jnp.bfloat16)                 # (TB*S, D) bf16

    # ---- l1: Linear(D_GPT, DLLM) then 4 x [SiLU, Linear(DLLM, DLLM)] ----
    h = jnp.dot(x, w0[...], preferred_element_type=jnp.float32) + b0[...]
    for w, b in ((w1, b1), (w2, b2), (w3, b3), (w4, b4)):
        h = jnp.dot(jax.nn.silu(h).astype(jnp.bfloat16), w[...],
                    preferred_element_type=jnp.float32) + b[...]

    # ---- mean over the sequence axis (torch .mean(dim=1)), in f32 ----
    dllm = h.shape[-1]
    hm = jnp.mean(h.reshape(tb, s, dllm), axis=1)                     # (TB, DLLM) f32
    hidden_ref[...] = hm.astype(hidden_ref.dtype)

    # ---- l2: 4 x [Linear(DLLM, DLLM), SiLU] then Linear(DLLM, num_classes_pad) ----
    g = hm
    for w, b in ((w5, b5), (w6, b6), (w7, b7), (w8, b8)):
        g = jax.nn.silu(
            jnp.dot(g.astype(jnp.bfloat16), w[...],
                    preferred_element_type=jnp.float32) + b[...])
    logits = jnp.dot(g.astype(jnp.bfloat16), w9[...],
                     preferred_element_type=jnp.float32) + b9[...]
    logits_ref[...] = logits.astype(logits_ref.dtype)


# ------------------------------- helpers --------------------------------------
def _round_up(x, m):
    return ((x + m - 1) // m) * m


def _choose_batch_tile(B, batch_tile):
    """Pick a sublane-dense batch tile; prefer an even (>=2) grid-step count (v7x)."""
    tb = min(_round_up(max(batch_tile, 8), 8), _round_up(B, 8))
    b_pad = _round_up(B, tb)
    if (b_pad // tb) % 2 == 1 and tb >= 16:
        tb_half = (tb // 2 // 8) * 8
        if tb_half >= 8:
            b_pad_half = _round_up(B, tb_half)
            if (b_pad_half // tb_half) % 2 == 0 and b_pad_half <= b_pad:
                tb, b_pad = tb_half, b_pad_half
    return tb, b_pad


def _resident_spec(shape):
    """Grid-invariant block (constant index_map): single-buffer it -> 1x VMEM."""
    ndim = len(shape)
    idx = lambda i: (0,) * ndim
    try:
        return pl.BlockSpec(shape, idx, pipeline_mode=pl.Buffered(1))
    except TypeError:                      # older jax without pipeline_mode kwarg
        return pl.BlockSpec(shape, idx)


def _vmem_ceiling_bytes():
    """Generation-aware VMEM cap: physical capacity minus ~16 MiB headroom."""
    try:
        cap = int(pltpu.get_tpu_info().vmem_capacity_bytes)
    except Exception:
        cap = 64 << 20                     # conservative (v7x-sized) fallback
    return max(32 << 20, cap - (16 << 20))  # ~48 MiB on v7x, ~112 MiB on v5e/v6e


# ------------------------------- wrapper --------------------------------------
def sc_interpreter_forward(input_ids, values, gpt_embeddings, params, *, batch_tile=64):
    """params: list of 10 (W, b) pairs, W: (in, out), b: (out,)."""
    B, S = input_ids.shape
    d_gpt = gpt_embeddings.shape[1]
    dllm = params[1][0].shape[0]
    num_classes = params[9][0].shape[1]
    nc_pad = max(128, _round_up(num_classes, 128))   # lane-dense logits

    tb, b_pad = _choose_batch_tile(B, batch_tile)

    # Glue: embedding gather only (bf16); value scaling happens inside the kernel.
    x = gpt_embeddings.astype(jnp.bfloat16)[input_ids]              # (B, S, D_GPT) bf16
    vals = values.astype(jnp.float32).reshape(B, S, 1)              # (B, S, 1) f32
    if b_pad != B:
        x = jnp.pad(x, ((0, b_pad - B), (0, 0), (0, 0)))
        vals = jnp.pad(vals, ((0, b_pad - B), (0, 0), (0, 0)))

    flat_weights, weight_specs = [], []
    for idx, (w, b) in enumerate(params):
        w = w.astype(jnp.bfloat16)            # bf16 weights: native MXU, half HBM/VMEM
        b = b.astype(jnp.float32)             # biases stay f32 (added to f32 acc)
        if idx == 9:                          # pad final projection to 128 columns
            w = jnp.pad(w, ((0, 0), (0, nc_pad - num_classes)))
            b = jnp.pad(b, ((0, nc_pad - num_classes),))
        b2d = b.reshape(1, -1)
        flat_weights += [w, b2d]
        weight_specs += [_resident_spec(w.shape), _resident_spec(b2d.shape)]

    # ---- VMEM budget: single-buffered weights + double-buffered I/O + live acts ----
    weight_bytes = sum(int(a.size) * a.dtype.itemsize for a in flat_weights)
    io_bytes = (tb * S * d_gpt * 2 + tb * S * 4          # x (bf16) + vals (f32) blocks
                + tb * nc_pad * 4 + tb * dllm * 4)       # logits + hidden blocks
    act_bytes = (tb * S * d_gpt * (4 + 2)                # scaled f32 + bf16 copy of x
                 + tb * S * dllm * (3 * 4 + 2)           # ~3 live f32 l1 slabs + bf16 copy
                 + tb * dllm * 4 * 4 + tb * nc_pad * 4)  # l2 activations
    vmem_needed = weight_bytes + 2 * io_bytes + act_bytes + (4 << 20)
    vmem_limit = int(min(max(vmem_needed, 32 << 20), _vmem_ceiling_bytes()))

    flops = int(2 * b_pad * S * (d_gpt * dllm + 4 * dllm * dllm)
                + 2 * b_pad * (4 * dllm * dllm + dllm * nc_pad))
    transcendentals = int(b_pad * S * dllm * 4 + b_pad * dllm * 4)   # SiLU sigmoids
    bytes_accessed = int(x.size * 2 + vals.size * 4 + weight_bytes
                         + b_pad * (nc_pad + dllm) * 4)

    grid_spec = pltpu.PrefetchScalarGridSpec(
        num_scalar_prefetch=0,
        grid=(b_pad // tb,),
        in_specs=[pl.BlockSpec((tb, S, d_gpt), lambda i: (i, 0, 0)),
                  pl.BlockSpec((tb, S, 1), lambda i: (i, 0, 0))] + weight_specs,
        out_specs=[
            pl.BlockSpec((tb, nc_pad), lambda i: (i, 0)),
            pl.BlockSpec((tb, dllm), lambda i: (i, 0)),
        ],
    )

    logits_pad, hidden_pad = pl.pallas_call(
        _scinterp_kernel,
        out_shape=(
            jax.ShapeDtypeStruct((b_pad, nc_pad), jnp.float32),
            jax.ShapeDtypeStruct((b_pad, dllm), jnp.float32),
        ),
        grid_spec=grid_spec,
        compiler_params=pltpu.CompilerParams(
            dimension_semantics=("parallel",),
            vmem_limit_bytes=vmem_limit,
        ),
        cost_estimate=pl.CostEstimate(flops=flops,
                                      transcendentals=transcendentals,
                                      bytes_accessed=bytes_accessed),
    )(x, vals, *flat_weights)

    return logits_pad[:B, :num_classes], hidden_pad[:B, :]


# ------------------------- deterministic param init ---------------------------
def init_params(key, d_gpt, dllm, num_classes, std=0.02):
    # Matches _init_weights: weight ~ N(0, std), bias = 0.
    shapes = ([(d_gpt, dllm)] + [(dllm, dllm)] * 4            # l1: 5 linears
              + [(dllm, dllm)] * 4 + [(dllm, num_classes)])   # l2: 5 linears
    params = []
    for (din, dout) in shapes:
        key, sub = jax.random.split(key)
        w = jax.random.normal(sub, (din, dout), jnp.float32) * std
        b = jnp.zeros((dout,), jnp.float32)
        params.append((w, b))
    return params


# ----------------------------- reference (same precision path) ----------------
def reference_forward(input_ids, values, gpt_embeddings, params):
    # Mirrors the kernel's bf16-operand / f32-accumulate numerics.
    emb = gpt_embeddings.astype(jnp.bfloat16)[input_ids].astype(jnp.float32)
    x = (emb * values[..., None]).astype(jnp.bfloat16)
    wb = [(w.astype(jnp.bfloat16), b.astype(jnp.float32)) for w, b in params]
    h = jnp.dot(x, wb[0][0], preferred_element_type=jnp.float32) + wb[0][1]
    for w, b in wb[1:5]:
        h = jnp.dot(jax.nn.silu(h).astype(jnp.bfloat16), w,
                    preferred_element_type=jnp.float32) + b
    hidden = h.mean(axis=1)
    g = hidden
    for w, b in wb[5:9]:
        g = jax.nn.silu(jnp.dot(g.astype(jnp.bfloat16), w,
                                preferred_element_type=jnp.float32) + b)
    logits = jnp.dot(g.astype(jnp.bfloat16), wb[9][0],
                     preferred_element_type=jnp.float32) + wb[9][1]
    return logits, hidden


if __name__ == "__main__":
    # Small, module-consistent shapes (DLLM=128 stands in for the real 4096).
    B, S = 16, 8           # batch, sequence length
    V = 32                 # gpt_embeddings vocab size
    D_GPT = 128            # gpt_embeddings.shape[1]
    DLLM = 128             # backbone hidden size stand-in
    NUM_CLASSES = 8

    key = jax.random.PRNGKey(0)
    k_emb, k_ids, k_vals, k_par = jax.random.split(key, 4)

    # gpt_embeddings buffer (deterministic synthetic, replaces torch.load).
    gpt_embeddings = jax.random.normal(k_emb, (V, D_GPT), jnp.float32) * 0.02
    input_ids = jax.random.randint(k_ids, (B, S), 0, V, dtype=jnp.int32)
    values = jax.random.uniform(k_vals, (B, S), jnp.float32, 0.0, 2.0)

    params = init_params(k_par, D_GPT, DLLM, NUM_CLASSES)

    logits, hidden = sc_interpreter_forward(input_ids, values, gpt_embeddings,
                                            params, batch_tile=64)
    jax.block_until_ready((logits, hidden))

    ref_logits, ref_hidden = reference_forward(input_ids, values, gpt_embeddings, params)
    assert logits.shape == (B, NUM_CLASSES) and hidden.shape == (B, DLLM)
    assert jnp.allclose(logits, ref_logits, atol=1e-6, rtol=2e-2), \
        float(jnp.max(jnp.abs(logits - ref_logits)))
    assert jnp.allclose(hidden, ref_hidden, atol=1e-6, rtol=2e-2), \
        float(jnp.max(jnp.abs(hidden - ref_hidden)))

    print("KERNEL_OK")
</pallas_src>

<mosaic_0001>
module attributes {stable_mosaic.version = 11 : i64} {
  func.func @_scinterp_kernel(%arg0: i32, %arg1: memref<8x8x128xbf16, #tpu.memory_space<vmem>>, %arg2: memref<8x8x1xf32, #tpu.memory_space<vmem>>, %arg3: memref<128x128xbf16, #tpu.memory_space<vmem>>, %arg4: memref<1x128xf32, #tpu.memory_space<vmem>>, %arg5: memref<128x128xbf16, #tpu.memory_space<vmem>>, %arg6: memref<1x128xf32, #tpu.memory_space<vmem>>, %arg7: memref<128x128xbf16, #tpu.memory_space<vmem>>, %arg8: memref<1x128xf32, #tpu.memory_space<vmem>>, %arg9: memref<128x128xbf16, #tpu.memory_space<vmem>>, %arg10: memref<1x128xf32, #tpu.memory_space<vmem>>, %arg11: memref<128x128xbf16, #tpu.memory_space<vmem>>, %arg12: memref<1x128xf32, #tpu.memory_space<vmem>>, %arg13: memref<128x128xbf16, #tpu.memory_space<vmem>>, %arg14: memref<1x128xf32, #tpu.memory_space<vmem>>, %arg15: memref<128x128xbf16, #tpu.memory_space<vmem>>, %arg16: memref<1x128xf32, #tpu.memory_space<vmem>>, %arg17: memref<128x128xbf16, #tpu.memory_space<vmem>>, %arg18: memref<1x128xf32, #tpu.memory_space<vmem>>, %arg19: memref<128x128xbf16, #tpu.memory_space<vmem>>, %arg20: memref<1x128xf32, #tpu.memory_space<vmem>>, %arg21: memref<128x128xbf16, #tpu.memory_space<vmem>>, %arg22: memref<1x128xf32, #tpu.memory_space<vmem>>, %arg23: memref<8x128xf32, #tpu.memory_space<vmem>>, %arg24: memref<8x128xf32, #tpu.memory_space<vmem>>) attributes {dimension_semantics = [#tpu.dimension_semantics<parallel>], iteration_bounds = array<i64: 2>, scalar_prefetch = 0 : i64, scratch_operands = 0 : i64, tpu.core_type = #tpu.core_type<tc>, window_params = [{transform_indices = @transform_0, window_bounds = array<i64: 8, 8, 128>}, {transform_indices = @transform_1, window_bounds = array<i64: 8, 8, 1>}, {pipeline_mode = #tpu.pipeline_mode<synchronous>, transform_indices = @transform_2, window_bounds = array<i64: 128, 128>}, {pipeline_mode = #tpu.pipeline_mode<synchronous>, transform_indices = @transform_3, window_bounds = array<i64: 1, 128>}, {pipeline_mode = #tpu.pipeline_mode<synchronous>, transform_indices = @transform_4, window_bounds = array<i64: 128, 128>}, {pipeline_mode = #tpu.pipeline_mode<synchronous>, transform_indices = @transform_5, window_bounds = array<i64: 1, 128>}, {pipeline_mode = #tpu.pipeline_mode<synchronous>, transform_indices = @transform_6, window_bounds = array<i64: 128, 128>}, {pipeline_mode = #tpu.pipeline_mode<synchronous>, transform_indices = @transform_7, window_bounds = array<i64: 1, 128>}, {pipeline_mode = #tpu.pipeline_mode<synchronous>, transform_indices = @transform_8, window_bounds = array<i64: 128, 128>}, {pipeline_mode = #tpu.pipeline_mode<synchronous>, transform_indices = @transform_9, window_bounds = array<i64: 1, 128>}, {pipeline_mode = #tpu.pipeline_mode<synchronous>, transform_indices = @transform_10, window_bounds = array<i64: 128, 128>}, {pipeline_mode = #tpu.pipeline_mode<synchronous>, transform_indices = @transform_11, window_bounds = array<i64: 1, 128>}, {pipeline_mode = #tpu.pipeline_mode<synchronous>, transform_indices = @transform_12, window_bounds = array<i64: 128, 128>}, {pipeline_mode = #tpu.pipeline_mode<synchronous>, transform_indices = @transform_13, window_bounds = array<i64: 1, 128>}, {pipeline_mode = #tpu.pipeline_mode<synchronous>, transform_indices = @transform_14, window_bounds = array<i64: 128, 128>}, {pipeline_mode = #tpu.pipeline_mode<synchronous>, transform_indices = @transform_15, window_bounds = array<i64: 1, 128>}, {pipeline_mode = #tpu.pipeline_mode<synchronous>, transform_indices = @transform_16, window_bounds = array<i64: 128, 128>}, {pipeline_mode = #tpu.pipeline_mode<synchronous>, transform_indices = @transform_17, window_bounds = array<i64: 1, 128>}, {pipeline_mode = #tpu.pipeline_mode<synchronous>, transform_indices = @transform_18, window_bounds = array<i64: 128, 128>}, {pipeline_mode = #tpu.pipeline_mode<synchronous>, transform_indices = @transform_19, window_bounds = array<i64: 1, 128>}, {pipeline_mode = #tpu.pipeline_mode<synchronous>, transform_indices = @transform_20, window_bounds = array<i64: 128, 128>}, {pipeline_mode = #tpu.pipeline_mode<synchronous>, transform_indices = @transform_21, window_bounds = array<i64: 1, 128>}, {transform_indices = @transform_22, window_bounds = array<i64: 8, 128>}, {transform_indices = @transform_23, window_bounds = array<i64: 8, 128>}]} {
    %c0 = arith.constant 0 : index
    %c0_0 = arith.constant 0 : index
    %c0_1 = arith.constant 0 : index
    %0 = vector.load %arg1[%c0, %c0_0, %c0_1] : memref<8x8x128xbf16, #tpu.memory_space<vmem>>, vector<8x8x128xbf16>
    %1 = arith.extf %0 : vector<8x8x128xbf16> to vector<8x8x128xf32>
    %c0_2 = arith.constant 0 : index
    %c0_3 = arith.constant 0 : index
    %c0_4 = arith.constant 0 : index
    %2 = vector.load %arg2[%c0_2, %c0_3, %c0_4] : memref<8x8x1xf32, #tpu.memory_space<vmem>>, vector<8x8x1xf32>
    %3 = vector.broadcast %2 : vector<8x8x1xf32> to vector<8x8x128xf32>
    %4 = arith.mulf %1, %3 : vector<8x8x128xf32>
    %5 = vector.shape_cast %4 : vector<8x8x128xf32> to vector<64x128xf32>
    %6 = arith.truncf %5 : vector<64x128xf32> to vector<64x128xbf16>
    %c0_5 = arith.constant 0 : index
    %c0_6 = arith.constant 0 : index
    %7 = vector.load %arg3[%c0_5, %c0_6] : memref<128x128xbf16, #tpu.memory_space<vmem>>, vector<128x128xbf16>
    %cst = arith.constant dense<0.000000e+00> : vector<64x128xf32>
    %8 = tpu.matmul %6, %7, %cst {dimension_numbers = #tpu.dot_dimension_numbers<[1], [0], [0], [1], [0, 0, 1, 1], [], []>} : vector<64x128xbf16>, vector<128x128xbf16>, vector<64x128xf32> -> vector<64x128xf32>
    %c0_7 = arith.constant 0 : index
    %c0_8 = arith.constant 0 : index
    %9 = vector.load %arg4[%c0_7, %c0_8] : memref<1x128xf32, #tpu.memory_space<vmem>>, vector<1x128xf32>
    %10 = vector.broadcast %9 : vector<1x128xf32> to vector<64x128xf32>
    %11 = arith.addf %8, %10 : vector<64x128xf32>
    %12 = arith.negf %11 : vector<64x128xf32>
    %13 = math.exp %12 : vector<64x128xf32>
    %cst_9 = arith.constant 1.000000e+00 : f32
    %14 = vector.broadcast %cst_9 : f32 to vector<64x128xf32>
    %15 = arith.addf %14, %13 : vector<64x128xf32>
    %16 = arith.divf %14, %15 : vector<64x128xf32>
    %17 = arith.mulf %11, %16 : vector<64x128xf32>
    %18 = arith.truncf %17 : vector<64x128xf32> to vector<64x128xbf16>
    %c0_10 = arith.constant 0 : index
    %c0_11 = arith.constant 0 : index
    %19 = vector.load %arg5[%c0_10, %c0_11] : memref<128x128xbf16, #tpu.memory_space<vmem>>, vector<128x128xbf16>
    %cst_12 = arith.constant dense<0.000000e+00> : vector<64x128xf32>
    %20 = tpu.matmul %18, %19, %cst_12 {dimension_numbers = #tpu.dot_dimension_numbers<[1], [0], [0], [1], [0, 0, 1, 1], [], []>} : vector<64x128xbf16>, vector<128x128xbf16>, vector<64x128xf32> -> vector<64x128xf32>
    %c0_13 = arith.constant 0 : index
    %c0_14 = arith.constant 0 : index
    %21 = vector.load %arg6[%c0_13, %c0_14] : memref<1x128xf32, #tpu.memory_space<vmem>>, vector<1x128xf32>
    %22 = vector.broadcast %21 : vector<1x128xf32> to vector<64x128xf32>
    %23 = arith.addf %20, %22 : vector<64x128xf32>
    %24 = arith.negf %23 : vector<64x128xf32>
    %25 = math.exp %24 : vector<64x128xf32>
    %cst_15 = arith.constant 1.000000e+00 : f32
    %26 = vector.broadcast %cst_15 : f32 to vector<64x128xf32>
    %27 = arith.addf %26, %25 : vector<64x128xf32>
    %28 = arith.divf %26, %27 : vector<64x128xf32>
    %29 = arith.mulf %23, %28 : vector<64x128xf32>
    %30 = arith.truncf %29 : vector<64x128xf32> to vector<64x128xbf16>
    %c0_16 = arith.constant 0 : index
    %c0_17 = arith.constant 0 : index
    %31 = vector.load %arg7[%c0_16, %c0_17] : memref<128x128xbf16, #tpu.memory_space<vmem>>, vector<128x128xbf16>
    %cst_18 = arith.constant dense<0.000000e+00> : vector<64x128xf32>
    %32 = tpu.matmul %30, %31, %cst_18 {dimension_numbers = #tpu.dot_dimension_numbers<[1], [0], [0], [1], [0, 0, 1, 1], [], []>} : vector<64x128xbf16>, vector<128x128xbf16>, vector<64x128xf32> -> vector<64x128xf32>
    %c0_19 = arith.constant 0 : index
    %c0_20 = arith.constant 0 : index
    %33 = vector.load %arg8[%c0_19, %c0_20] : memref<1x128xf32, #tpu.memory_space<vmem>>, vector<1x128xf32>
    %34 = vector.broadcast %33 : vector<1x128xf32> to vector<64x128xf32>
    %35 = arith.addf %32, %34 : vector<64x128xf32>
    %36 = arith.negf %35 : vector<64x128xf32>
    %37 = math.exp %36 : vector<64x128xf32>
    %cst_21 = arith.constant 1.000000e+00 : f32
    %38 = vector.broadcast %cst_21 : f32 to vector<64x128xf32>
    %39 = arith.addf %38, %37 : vector<64x128xf32>
    %40 = arith.divf %38, %39 : vector<64x128xf32>
    %41 = arith.mulf %35, %40 : vector<64x128xf32>
    %42 = arith.truncf %41 : vector<64x128xf32> to vector<64x128xbf16>
    %c0_22 = arith.constant 0 : index
    %c0_23 = arith.constant 0 : index
    %43 = vector.load %arg9[%c0_22, %c0_23] : memref<128x128xbf16, #tpu.memory_space<vmem>>, vector<128x128xbf16>
    %cst_24 = arith.constant dense<0.000000e+00> : vector<64x128xf32>
    %44 = tpu.matmul %42, %43, %cst_24 {dimension_numbers = #tpu.dot_dimension_numbers<[1], [0], [0], [1], [0, 0, 1, 1], [], []>} : vector<64x128xbf16>, vector<128x128xbf16>, vector<64x128xf32> -> vector<64x128xf32>
    %c0_25 = arith.constant 0 : index
    %c0_26 = arith.constant 0 : index
    %45 = vector.load %arg10[%c0_25, %c0_26] : memref<1x128xf32, #tpu.memory_space<vmem>>, vector<1x128xf32>
    %46 = vector.broadcast %45 : vector<1x128xf32> to vector<64x128xf32>
    %47 = arith.addf %44, %46 : vector<64x128xf32>
    %48 = arith.negf %47 : vector<64x128xf32>
    %49 = math.exp %48 : vector<64x128xf32>
    %cst_27 = arith.constant 1.000000e+00 : f32
    %50 = vector.broadcast %cst_27 : f32 to vector<64x128xf32>
    %51 = arith.addf %50, %49 : vector<64x128xf32>
    %52 = arith.divf %50, %51 : vector<64x128xf32>
    %53 = arith.mulf %47, %52 : vector<64x128xf32>
    %54 = arith.truncf %53 : vector<64x128xf32> to vector<64x128xbf16>
    %c0_28 = arith.constant 0 : index
    %c0_29 = arith.constant 0 : index
    %55 = vector.load %arg11[%c0_28, %c0_29] : memref<128x128xbf16, #tpu.memory_space<vmem>>, vector<128x128xbf16>
    %cst_30 = arith.constant dense<0.000000e+00> : vector<64x128xf32>
    %56 = tpu.matmul %54, %55, %cst_30 {dimension_numbers = #tpu.dot_dimension_numbers<[1], [0], [0], [1], [0, 0, 1, 1], [], []>} : vector<64x128xbf16>, vector<128x128xbf16>, vector<64x128xf32> -> vector<64x128xf32>
    %c0_31 = arith.constant 0 : index
    %c0_32 = arith.constant 0 : index
    %57 = vector.load %arg12[%c0_31, %c0_32] : memref<1x128xf32, #tpu.memory_space<vmem>>, vector<1x128xf32>
    %58 = vector.broadcast %57 : vector<1x128xf32> to vector<64x128xf32>
    %59 = arith.addf %56, %58 : vector<64x128xf32>
    %60 = vector.shape_cast %59 : vector<64x128xf32> to vector<8x8x128xf32>
    %cst_33 = arith.constant dense<0.000000e+00> : vector<8x128xf32>
    %61 = vector.multi_reduction <add>, %60, %cst_33 [1] : vector<8x8x128xf32> to vector<8x128xf32>
    %cst_34 = arith.constant 8.000000e+00 : f32
    %62 = vector.broadcast %cst_34 : f32 to vector<8x128xf32>
    %63 = arith.divf %61, %62 : vector<8x128xf32>
    %c0_35 = arith.constant 0 : index
    %c0_36 = arith.constant 0 : index
    %64 = vector.load %arg24[%c0_35, %c0_36] : memref<8x128xf32, #tpu.memory_space<vmem>>, vector<8x128xf32>
    tpu.vector_store %arg24[%c0_35, %c0_36], %63 {strides = array<i32>} : memref<8x128xf32, #tpu.memory_space<vmem>>, vector<8x128xf32>,
    %65 = arith.truncf %63 : vector<8x128xf32> to vector<8x128xbf16>
    %c0_37 = arith.constant 0 : index
    %c0_38 = arith.constant 0 : index
    %66 = vector.load %arg13[%c0_37, %c0_38] : memref<128x128xbf16, #tpu.memory_space<vmem>>, vector<128x128xbf16>
    %cst_39 = arith.constant dense<0.000000e+00> : vector<8x128xf32>
    %67 = tpu.matmul %65, %66, %cst_39 {dimension_numbers = #tpu.dot_dimension_numbers<[1], [0], [0], [1], [0, 0, 1, 1], [], []>} : vector<8x128xbf16>, vector<128x128xbf16>, vector<8x128xf32> -> vector<8x128xf32>
    %c0_40 = arith.constant 0 : index
    %c0_41 = arith.constant 0 : index
    %68 = vector.load %arg14[%c0_40, %c0_41] : memref<1x128xf32, #tpu.memory_space<vmem>>, vector<1x128xf32>
    %69 = vector.broadcast %68 : vector<1x128xf32> to vector<8x128xf32>
    %70 = arith.addf %67, %69 : vector<8x128xf32>
    %71 = arith.negf %70 : vector<8x128xf32>
    %72 = math.exp %71 : vector<8x128xf32>
    %cst_42 = arith.constant 1.000000e+00 : f32
    %73 = vector.broadcast %cst_42 : f32 to vector<8x128xf32>
    %74 = arith.addf %73, %72 : vector<8x128xf32>
    %75 = arith.divf %73, %74 : vector<8x128xf32>
    %76 = arith.mulf %70, %75 : vector<8x128xf32>
    %77 = arith.truncf %76 : vector<8x128xf32> to vector<8x128xbf16>
    %c0_43 = arith.constant 0 : index
    %c0_44 = arith.constant 0 : index
    %78 = vector.load %arg15[%c0_43, %c0_44] : memref<128x128xbf16, #tpu.memory_space<vmem>>, vector<128x128xbf16>
    %cst_45 = arith.constant dense<0.000000e+00> : vector<8x128xf32>
    %79 = tpu.matmul %77, %78, %cst_45 {dimension_numbers = #tpu.dot_dimension_numbers<[1], [0], [0], [1], [0, 0, 1, 1], [], []>} : vector<8x128xbf16>, vector<128x128xbf16>, vector<8x128xf32> -> vector<8x128xf32>
    %c0_46 = arith.constant 0 : index
    %c0_47 = arith.constant 0 : index
    %80 = vector.load %arg16[%c0_46, %c0_47] : memref<1x128xf32, #tpu.memory_space<vmem>>, vector<1x128xf32>
    %81 = vector.broadcast %80 : vector<1x128xf32> to vector<8x128xf32>
    %82 = arith.addf %79, %81 : vector<8x128xf32>
    %83 = arith.negf %82 : vector<8x128xf32>
    %84 = math.exp %83 : vector<8x128xf32>
    %cst_48 = arith.constant 1.000000e+00 : f32
    %85 = vector.broadcast %cst_48 : f32 to vector<8x128xf32>
    %86 = arith.addf %85, %84 : vector<8x128xf32>
    %87 = arith.divf %85, %86 : vector<8x128xf32>
    %88 = arith.mulf %82, %87 : vector<8x128xf32>
    %89 = arith.truncf %88 : vector<8x128xf32> to vector<8x128xbf16>
    %c0_49 = arith.constant 0 : index
    %c0_50 = arith.constant 0 : index
    %90 = vector.load %arg17[%c0_49, %c0_50] : memref<128x128xbf16, #tpu.memory_space<vmem>>, vector<128x128xbf16>
    %cst_51 = arith.constant dense<0.000000e+00> : vector<8x128xf32>
    %91 = tpu.matmul %89, %90, %cst_51 {dimension_numbers = #tpu.dot_dimension_numbers<[1], [0], [0], [1], [0, 0, 1, 1], [], []>} : vector<8x128xbf16>, vector<128x128xbf16>, vector<8x128xf32> -> vector<8x128xf32>
    %c0_52 = arith.constant 0 : index
    %c0_53 = arith.constant 0 : index
    %92 = vector.load %arg18[%c0_52, %c0_53] : memref<1x128xf32, #tpu.memory_space<vmem>>, vector<1x128xf32>
    %93 = vector.broadcast %92 : vector<1x128xf32> to vector<8x128xf32>
    %94 = arith.addf %91, %93 : vector<8x128xf32>
    %95 = arith.negf %94 : vector<8x128xf32>
    %96 = math.exp %95 : vector<8x128xf32>
    %cst_54 = arith.constant 1.000000e+00 : f32
    %97 = vector.broadcast %cst_54 : f32 to vector<8x128xf32>
    %98 = arith.addf %97, %96 : vector<8x128xf32>
    %99 = arith.divf %97, %98 : vector<8x128xf32>
    %100 = arith.mulf %94, %99 : vector<8x128xf32>
    %101 = arith.truncf %100 : vector<8x128xf32> to vector<8x128xbf16>
    %c0_55 = arith.constant 0 : index
    %c0_56 = arith.constant 0 : index
    %102 = vector.load %arg19[%c0_55, %c0_56] : memref<128x128xbf16, #tpu.memory_space<vmem>>, vector<128x128xbf16>
    %cst_57 = arith.constant dense<0.000000e+00> : vector<8x128xf32>
    %103 = tpu.matmul %101, %102, %cst_57 {dimension_numbers = #tpu.dot_dimension_numbers<[1], [0], [0], [1], [0, 0, 1, 1], [], []>} : vector<8x128xbf16>, vector<128x128xbf16>, vector<8x128xf32> -> vector<8x128xf32>
    %c0_58 = arith.constant 0 : index
    %c0_59 = arith.constant 0 : index
    %104 = vector.load %arg20[%c0_58, %c0_59] : memref<1x128xf32, #tpu.memory_space<vmem>>, vector<1x128xf32>
    %105 = vector.broadcast %104 : vector<1x128xf32> to vector<8x128xf32>
    %106 = arith.addf %103, %105 : vector<8x128xf32>
    %107 = arith.negf %106 : vector<8x128xf32>
    %108 = math.exp %107 : vector<8x128xf32>
    %cst_60 = arith.constant 1.000000e+00 : f32
    %109 = vector.broadcast %cst_60 : f32 to vector<8x128xf32>
    %110 = arith.addf %109, %108 : vector<8x128xf32>
    %111 = arith.divf %109, %110 : vector<8x128xf32>
    %112 = arith.mulf %106, %111 : vector<8x128xf32>
    %113 = arith.truncf %112 : vector<8x128xf32> to vector<8x128xbf16>
    %c0_61 = arith.constant 0 : index
    %c0_62 = arith.constant 0 : index
    %114 = vector.load %arg21[%c0_61, %c0_62] : memref<128x128xbf16, #tpu.memory_space<vmem>>, vector<128x128xbf16>
    %cst_63 = arith.constant dense<0.000000e+00> : vector<8x128xf32>
    %115 = tpu.matmul %113, %114, %cst_63 {dimension_numbers = #tpu.dot_dimension_numbers<[1], [0], [0], [1], [0, 0, 1, 1], [], []>} : vector<8x128xbf16>, vector<128x128xbf16>, vector<8x128xf32> -> vector<8x128xf32>
    %c0_64 = arith.constant 0 : index
    %c0_65 = arith.constant 0 : index
    %116 = vector.load %arg22[%c0_64, %c0_65] : memref<1x128xf32, #tpu.memory_space<vmem>>, vector<1x128xf32>
    %117 = vector.broadcast %116 : vector<1x128xf32> to vector<8x128xf32>
    %118 = arith.addf %115, %117 : vector<8x128xf32>
    %c0_66 = arith.constant 0 : index
    %c0_67 = arith.constant 0 : index
    %119 = vector.load %arg23[%c0_66, %c0_67] : memref<8x128xf32, #tpu.memory_space<vmem>>, vector<8x128xf32>
    tpu.vector_store %arg23[%c0_66, %c0_67], %118 {strides = array<i32>} : memref<8x128xf32, #tpu.memory_space<vmem>>, vector<8x128xf32>,
    return
  }
  func.func @transform_0(%arg0: i32) -> (i32, i32, i32) {
    %c0_i32 = arith.constant 0 : i32
    %c0_i32_0 = arith.constant 0 : i32
    %c0_i32_1 = arith.constant 0 : i32
    return %arg0, %c0_i32, %c0_i32_0 : i32, i32, i32
  }
  func.func @transform_1(%arg0: i32) -> (i32, i32, i32) {
    %c0_i32 = arith.constant 0 : i32
    %c0_i32_0 = arith.constant 0 : i32
    %c0_i32_1 = arith.constant 0 : i32
    return %arg0, %c0_i32, %c0_i32_0 : i32, i32, i32
  }
  func.func @transform_2(%arg0: i32) -> (i32, i32) {
    %c0_i32 = arith.constant 0 : i32
    %c0_i32_0 = arith.constant 0 : i32
    %c0_i32_1 = arith.constant 0 : i32
    return %c0_i32, %c0_i32_0 : i32, i32
  }
  func.func @transform_3(%arg0: i32) -> (i32, i32) {
    %c0_i32 = arith.constant 0 : i32
    %c0_i32_0 = arith.constant 0 : i32
    %c0_i32_1 = arith.constant 0 : i32
    return %c0_i32, %c0_i32_0 : i32, i32
  }
  func.func @transform_4(%arg0: i32) -> (i32, i32) {
    %c0_i32 = arith.constant 0 : i32
    %c0_i32_0 = arith.constant 0 : i32
    %c0_i32_1 = arith.constant 0 : i32
    return %c0_i32, %c0_i32_0 : i32, i32
  }
  func.func @transform_5(%arg0: i32) -> (i32, i32) {
    %c0_i32 = arith.constant 0 : i32
    %c0_i32_0 = arith.constant 0 : i32
    %c0_i32_1 = arith.constant 0 : i32
    return %c0_i32, %c0_i32_0 : i32, i32
  }
  func.func @transform_6(%arg0: i32) -> (i32, i32) {
    %c0_i32 = arith.constant 0 : i32
    %c0_i32_0 = arith.constant 0 : i32
    %c0_i32_1 = arith.constant 0 : i32
    return %c0_i32, %c0_i32_0 : i32, i32
  }
  func.func @transform_7(%arg0: i32) -> (i32, i32) {
    %c0_i32 = arith.constant 0 : i32
    %c0_i32_0 = arith.constant 0 : i32
    %c0_i32_1 = arith.constant 0 : i32
    return %c0_i32, %c0_i32_0 : i32, i32
  }
  func.func @transform_8(%arg0: i32) -> (i32, i32) {
    %c0_i32 = arith.constant 0 : i32
    %c0_i32_0 = arith.constant 0 : i32
    %c0_i32_1 = arith.constant 0 : i32
    return %c0_i32, %c0_i32_0 : i32, i32
  }
  func.func @transform_9(%arg0: i32) -> (i32, i32) {
    %c0_i32 = arith.constant 0 : i32
    %c0_i32_0 = arith.constant 0 : i32
    %c0_i32_1 = arith.constant 0 : i32
    return %c0_i32, %c0_i32_0 : i32, i32
  }
  func.func @transform_10(%arg0: i32) -> (i32, i32) {
    %c0_i32 = arith.constant 0 : i32
    %c0_i32_0 = arith.constant 0 : i32
    %c0_i32_1 = arith.constant 0 : i32
    return %c0_i32, %c0_i32_0 : i32, i32
  }
  func.func @transform_11(%arg0: i32) -> (i32, i32) {
    %c0_i32 = arith.constant 0 : i32
    %c0_i32_0 = arith.constant 0 : i32
    %c0_i32_1 = arith.constant 0 : i32
    return %c0_i32, %c0_i32_0 : i32, i32
  }
  func.func @transform_12(%arg0: i32) -> (i32, i32) {
    %c0_i32 = arith.constant 0 : i32
    %c0_i32_0 = arith.constant 0 : i32
    %c0_i32_1 = arith.constant 0 : i32
    return %c0_i32, %c0_i32_0 : i32, i32
  }
  func.func @transform_13(%arg0: i32) -> (i32, i32) {
    %c0_i32 = arith.constant 0 : i32
    %c0_i32_0 = arith.constant 0 : i32
    %c0_i32_1 = arith.constant 0 : i32
    return %c0_i32, %c0_i32_0 : i32, i32
  }
  func.func @transform_14(%arg0: i32) -> (i32, i32) {
    %c0_i32 = arith.constant 0 : i32
    %c0_i32_0 = arith.constant 0 : i32
    %c0_i32_1 = arith.constant 0 : i32
    return %c0_i32, %c0_i32_0 : i32, i32
  }
  func.func @transform_15(%arg0: i32) -> (i32, i32) {
    %c0_i32 = arith.constant 0 : i32
    %c0_i32_0 = arith.constant 0 : i32
    %c0_i32_1 = arith.constant 0 : i32
    return %c0_i32, %c0_i32_0 : i32, i32
  }
  func.func @transform_16(%arg0: i32) -> (i32, i32) {
    %c0_i32 = arith.constant 0 : i32
    %c0_i32_0 = arith.constant 0 : i32
    %c0_i32_1 = arith.constant 0 : i32
    return %c0_i32, %c0_i32_0 : i32, i32
  }
  func.func @transform_17(%arg0: i32) -> (i32, i32) {
    %c0_i32 = arith.constant 0 : i32
    %c0_i32_0 = arith.constant 0 : i32
    %c0_i32_1 = arith.constant 0 : i32
    return %c0_i32, %c0_i32_0 : i32, i32
  }
  func.func @transform_18(%arg0: i32) -> (i32, i32) {
    %c0_i32 = arith.constant 0 : i32
    %c0_i32_0 = arith.constant 0 : i32
    %c0_i32_1 = arith.constant 0 : i32
    return %c0_i32, %c0_i32_0 : i32, i32
  }
  func.func @transform_19(%arg0: i32) -> (i32, i32) {
    %c0_i32 = arith.constant 0 : i32
    %c0_i32_0 = arith.constant 0 : i32
    %c0_i32_1 = arith.constant 0 : i32
    return %c0_i32, %c0_i32_0 : i32, i32
  }
  func.func @transform_20(%arg0: i32) -> (i32, i32) {
    %c0_i32 = arith.constant 0 : i32
    %c0_i32_0 = arith.constant 0 : i32
    %c0_i32_1 = arith.constant 0 : i32
    return %c0_i32, %c0_i32_0 : i32, i32
  }
  func.func @transform_21(%arg0: i32) -> (i32, i32) {
    %c0_i32 = arith.constant 0 : i32
    %c0_i32_0 = arith.constant 0 : i32
    %c0_i32_1 = arith.constant 0 : i32
    return %c0_i32, %c0_i32_0 : i32, i32
  }
  func.func @transform_22(%arg0: i32) -> (i32, i32) {
    %c0_i32 = arith.constant 0 : i32
    %c0_i32_0 = arith.constant 0 : i32
    return %arg0, %c0_i32 : i32, i32
  }
  func.func @transform_23(%arg0: i32) -> (i32, i32) {
    %c0_i32 = arith.constant 0 : i32
    %c0_i32_0 = arith.constant 0 : i32
    return %arg0, %c0_i32 : i32, i32
  }
}

</mosaic_0001>

<bundles_post_ra>
// kernel: tpu_custom_call.1
= control target key start
LH: loop header
LB: loop body
LE: loop exit
PB: predicated region body
PF: predicated region fallthrough
CT: control target
= control target key end

     0   :  { %s4818_s0 = inlined_call_operand.vmem [shape: bf16[16,8,128], index: 0, kind: input, shape index: {}]   ;;  %s4819_s1 = inlined_call_operand.vmem [shape: f32[16,8,1], index: 1, kind: input, shape index: {}]   ;;  %s4820_s2 = inlined_call_operand.vmem [shape: bf16[128,128], index: 2, kind: input, shape index: {}]   ;;  %s4821_s3 = inlined_call_operand.vmem [shape: f32[1,128], index: 3, kind: input, shape index: {}]   ;;  %s4822_s4 = inlined_call_operand.hbm [shape: bf16[128,128], index: 4, kind: input, shape index: {}]   ;;  %s4823_s5 = inlined_call_operand.vmem [shape: f32[1,128], index: 5, kind: input, shape index: {}]   ;;  %s4824_s6 = inlined_call_operand.hbm [shape: bf16[128,128], index: 6, kind: input, shape index: {}]   ;;  %s4825_s7 = inlined_call_operand.vmem [shape: f32[1,128], index: 7, kind: input, shape index: {}]   ;;  %s4826_s8 = inlined_call_operand.hbm [shape: bf16[128,128], index: 8, kind: input, shape index: {}]   ;;  %s4827_s9 = inlined_call_operand.vmem [shape: f32[1,128], index: 9, kind: input, shape index: {}]   ;;  %s4828_s10 = inlined_call_operand.hbm [shape: bf16[128,128], index: 10, kind: input, shape index: {}]   ;;  %s4829_s11 = inlined_call_operand.vmem [shape: f32[1,128], index: 11, kind: input, shape index: {}]   ;;  %s4830_s12 = inlined_call_operand.hbm [shape: bf16[128,128], index: 12, kind: input, shape index: {}]   ;;  %s4831_s13 = inlined_call_operand.vmem [shape: f32[1,128], index: 13, kind: input, shape index: {}]   ;;  %s4832_s14 = inlined_call_operand.hbm [shape: bf16[128,128], index: 14, kind: input, shape index: {}]   ;;  %s4833_s15 = inlined_call_operand.vmem [shape: f32[1,128], index: 15, kind: input, shape index: {}]   ;;  %s4834_s16 = inlined_call_operand.hbm [shape: bf16[128,128], index: 16, kind: input, shape index: {}]   ;;  %s4835_s17 = inlined_call_operand.vmem [shape: f32[1,128], index: 17, kind: input, shape index: {}]   ;;  %s4836_s18 = inlined_call_operand.hbm [shape: bf16[128,128], index: 18, kind: input, shape index: {}]   ;;  %s4837_s19 = inlined_call_operand.vmem [shape: f32[1,128], index: 19, kind: input, shape index: {}]   ;;  %s4838_s20 = inlined_call_operand.hbm [shape: bf16[128,128], index: 20, kind: input, shape index: {}]   ;;  %s4839_s21 = inlined_call_operand.vmem [shape: f32[1,128], index: 21, kind: input, shape index: {}]   ;;  %s4840_s22 = inlined_call_operand.hbm [shape: f32[16,128], index: 22, kind: output, shape index: {0}]   ;;  %s4841_s23 = inlined_call_operand.hbm [shape: f32[16,128], index: 23, kind: output, shape index: {1}]  }
   0x1   :  { %4852 = sst [smem:[#allocation33_spill]] %s4818_s0 }
   0x2   :  { %4853 = sst [smem:[#allocation34_spill]] %s4819_s1 }
   0x3   :  { %4854 = sst [smem:[#allocation35_spill]] %s4820_s2 }
   0x4   :  { %4855 = sst [smem:[#allocation36_spill]] %s4821_s3 }
   0x5   :  { %4856 = sst [smem:[#allocation37_spill]] %s4822_s4 }
   0x6   :  { %4857 = sst [smem:[#allocation38_spill]] %s4823_s5 }
   0x7   :  { %4858 = sst [smem:[#allocation39_spill]] %s4824_s6 }
   0x8   :  { %4859 = sst [smem:[#allocation40_spill]] %s4825_s7 }
   0x9   :  { %4860 = sst [smem:[#allocation41_spill]] %s4826_s8 }
   0xa   :  { %4861 = sst [smem:[#allocation42_spill]] %s4828_s10 }
   0xb   :  { %4862 = sst [smem:[#allocation43_spill]] %s4832_s14 }
   0xc   :  { %4863 = sst [smem:[#allocation44_spill]] %s4839_s21 }
   0xd   :  { %4864 = sst [smem:[#allocation45_spill]] %s4840_s22 }
   0xe   :  { %4865 = sst [smem:[#allocation46_spill]] %s4841_s23 }
   0xf   :  { %29 = vsyncpa [#allocation3], 0 }
  0x10   :  { %30 = vsyncpa [#allocation6], 0 }
  0x11   :  { %31 = vsyncpa [#allocation9], 0 }
  0x12   :  { %32 = vsyncpa [#allocation12], 0 }
  0x13   :  { %33 = vsyncpa [#allocation15], 0 }
  0x14   :  { %34 = vsyncpa [#allocation4], 0 }
  0x15   :  { %36 = vsyncpa [#allocation4 + $0x1], 0 }
  0x16   :  { %37 = vsyncpa [#allocation19], 0 }
  0x17   :  { %39 = vsyncpa [#allocation19 + $0x1], 0  ;;  %s4261_s4 = smov 0   ;;  %s4263_s30 = smov 0  }
  0x18   :  { %s4265_s24 = smov 0   ;;  %s4267_s25 = smov 0  }
  0x19 LB: > { %4866 = sst [smem:[#allocation27_spill]] %s4114_s4  ;;  %s4282_s5 = sadd.s32 4294967295, %s4126_s25   ;;  %s4126_s25 = sphi %s4267_s25, %s4907_s25   ;;  %s4122_s24 = sphi %s4265_s24, %s4909_s24   ;;  %s4118_s30 = sphi %s4263_s30, %s4911_s30   ;;  %s4114_s4 = sphi %s4261_s4, %s4910_s4  }
  0x1a   : > { %4867 = sst [smem:[#allocation28_spill]] %s4122_s24  ;;  %s2947_s1 = sadd.s32 4294967294, %s4126_s25  }
  0x1b   : > { %4868 = sst [smem:[#allocation29_spill]] %s4126_s25  ;;  %s4286_s26 = sadd.s32 1, %s4126_s25  }
  0x1c   : > { %4869 = sst [smem:[#allocation30_spill]] %s4286_s26  ;;  %s524_s2 = sadd.s32 1, %s4122_s24 }
  0x1d   : > { %s521_s6 = ssub.s32 %s4126_s25, %s4286_s26  ;;  %p534_p0 = scmp.ne.s32.totalorder %s4122_s24, %s4118_s30 }
  0x1e   : > { %p522_p1 = scmp.eq.s32.totalorder %s521_s6, 0  ;;  %p535_p2 = scmp.eq.s32.totalorder %s4282_s5, 1 }
  0x1f   : > { %p540_p3 = scmp.ne.s32.totalorder %s4118_s30, %s4114_s4  ;;  %p541_p4 = scmp.eq.s32.totalorder %s2947_s1, 1 }
  0x20   : > { %s4297_s27 = scalar_select %p522_p1, %s4122_s24, %s524_s2  }
  0x21   : > { %p4299_p5 = por %p535_p2, %p534_p0  ;;  %p4303_p6 = por %p541_p4, %p540_p3 }
  0x22   : > { %4870 = sst [smem:[#allocation31_spill]] %s4297_s27  ;;  %p2948_p7 = scmp.ge.s32.totalorder %s4126_s25, 1 }
  0x23   : > { %s4872_s28 = scalar_select %p4303_p6, 1, 0 }
  0x24   : > { %p574_p8 = scmp.lt.s32.totalorder %s4126_s25, 3  ;;  %p3519_p9 = scmp.eq.s32.totalorder %s4282_s5, 0 }
  0x25   : > { %4873 = sst [smem:[#allocation32_spill]] %s4872_s28  ;;  %s4128_s28 = smov [#allocation5]  }
  0x26   : > { %p4310_p10 = pnand %p2948_p7, %p574_p8  ;;  %s4875_s1 = sld [smem:[#allocation39_spill]] }
  0x27   : > { %s4876_s10 = sld [smem:[#allocation42_spill]]  ;;  %s610_s4 = sshll.u32 %s4128_s28, 4  ;;  %s611_s4 = int_to_ptr.vmem [resolvable:$true] %s610_s4 }
  0x28   : > { %p3484_p11 = pneg %p4310_p10  ;;  %s4129_s3 = smov 64  }
  0x29   : > { %s4130_s0 = smov 4   ;;  %s4131_s27 = smov [#allocation8]  }
  0x2a   : > { %p4324_p12 = pnand %p3519_p9, %p3484_p11  ;;  %s4878_s14 = sld [smem:[#allocation43_spill]] }
  0x2b   : > { %s710_s22 = sshll.u32 %s4836_s18, 4  ;;  %s4132_s23 = smov [#allocation11]   ;;  %s711_s22 = int_to_ptr.hbm [resolvable:$true] %s710_s22 }
  0x2c   : > { %s608_s2 = sshll.u32 %s4875_s1, 4  ;;  %s644_s1 = sshll.u32 %s4131_s27, 4  ;;  %s609_s2 = int_to_ptr.hbm [resolvable:$true] %s608_s2  ;;  %s645_s1 = int_to_ptr.vmem [resolvable:$true] %s644_s1 }
  0x2d   : > { %s642_s24 = sshll.u32 %s4876_s10, 4  ;;  %s4133_s10 = smov [#allocation14]   ;;  %s643_s24 = int_to_ptr.hbm [resolvable:$true] %s642_s24 }
  0x2e   : > { %3490 = dma.hbm_to_vmem [thread:$0]  (!%p4324_p12), %s609_s2, 1024, %s611_s4, [#allocation6], %s4129_s3, %s4129_s3, %s4130_s0  }
  0x2f   : > { %3496 = dma.hbm_to_vmem [thread:$0]  (!%p4324_p12), %s643_s24, 1024, %s645_s1, [#allocation9], %s4129_s3, %s4129_s3, %s4130_s0  }
  0x30   : > { %s676_s25 = sshll.u32 %s4878_s14, 4  ;;  %s678_s4 = sshll.u32 %s4132_s23, 4  ;;  %s677_s25 = int_to_ptr.hbm [resolvable:$true] %s676_s25  ;;  %s679_s4 = int_to_ptr.vmem [resolvable:$true] %s678_s4 }
  0x31   : > { %3502 = dma.hbm_to_vmem [thread:$0]  (!%p4324_p12), %s677_s25, 1024, %s679_s4, [#allocation12], %s4129_s3, %s4129_s3, %s4130_s0  }
  0x32   : > { %s712_s2 = sshll.u32 %s4133_s10, 4  ;;  %s4879_s14 = sld [smem:[#allocation37_spill]]  ;;  %s713_s2 = int_to_ptr.vmem [resolvable:$true] %s712_s2 }
  0x33   : > { %3508 = dma.hbm_to_vmem [thread:$0]  (!%p4324_p12), %s711_s22, 1024, %s713_s2, [#allocation15], %s4129_s3, %s4129_s3, %s4130_s0  }
  0x34   : > { %s4880_s8 = sld [smem:[#allocation41_spill]]  ;;  %s4134_s28 = smov [#allocation2]  }
  0x35   : > { %s593_s25 = sshll.u32 %s4134_s28, 4  ;;  %s659_s22 = sshll.u32 %s4830_s12, 4  ;;  %s594_s25 = int_to_ptr.vmem [resolvable:$true] %s593_s25  ;;  %s660_s22 = int_to_ptr.hbm [resolvable:$true] %s659_s22 }
  0x36   : > { %s693_s21 = sshll.u32 %s4834_s16, 4  ;;  %s4137_s28 = smov [#allocation13]   ;;  %s694_s21 = int_to_ptr.hbm [resolvable:$true] %s693_s21 }
  0x38   : > { %s591_s24 = sshll.u32 %s4879_s14, 4  ;;  %s4135_s14 = smov [#allocation7]   ;;  %s592_s24 = int_to_ptr.hbm [resolvable:$true] %s591_s24 }
  0x39   : > { %3487 = dma.hbm_to_vmem [thread:$0]  (!%p4324_p12), %s592_s24, 1024, %s594_s25, [#allocation3], %s4129_s3, %s4129_s3, %s4130_s0  }
  0x3a   : > { %s625_s1 = sshll.u32 %s4880_s8, 4  ;;  %s627_s4 = sshll.u32 %s4135_s14, 4  ;;  %s626_s1 = int_to_ptr.hbm [resolvable:$true] %s625_s1  ;;  %s628_s4 = int_to_ptr.vmem [resolvable:$true] %s627_s4 }
  0x3b   : > { %3493 = dma.hbm_to_vmem [thread:$0]  (!%p4324_p12), %s626_s1, 1024, %s628_s4, [#allocation6], %s4129_s3, %s4129_s3, %s4130_s0  }
  0x3c   : > { %s4136_s24 = smov [#allocation10]   ;;  %s695_s25 = sshll.u32 %s4137_s28, 4  ;;  %s696_s25 = int_to_ptr.vmem [resolvable:$true] %s695_s25 }
  0x3d   : > { %s661_s23 = sshll.u32 %s4136_s24, 4  ;;  %s727_s1 = sshll.u32 %s4838_s20, 4  ;;  %s662_s23 = int_to_ptr.vmem [resolvable:$true] %s661_s23  ;;  %s728_s1 = int_to_ptr.hbm [resolvable:$true] %s727_s1 }
  0x3e   : > { %3499 = dma.hbm_to_vmem [thread:$0]  (!%p4324_p12), %s660_s22, 1024, %s662_s23, [#allocation9], %s4129_s3, %s4129_s3, %s4130_s0  }
  0x3f   : > { %3505 = dma.hbm_to_vmem [thread:$0]  (!%p4324_p12), %s694_s21, 1024, %s696_s25, [#allocation12], %s4129_s3, %s4129_s3, %s4130_s0  }
  0x40   : > { %s4138_s4 = smov [#allocation16]   ;;  %766 = sbr.rel (%p4310_p10) target bundleno = 1896 (0x768), region = 108 }
  0x41   : > { %s729_s27 = sshll.u32 %s4138_s4, 4  ;;  %s730_s27 = int_to_ptr.vmem [resolvable:$true] %s729_s27 }
  0x42   : > { %3511 = dma.hbm_to_vmem [thread:$0]  (!%p4324_p12), %s728_s1, 1024, %s730_s27, [#allocation15], %s4129_s3, %s4129_s3, %s4130_s0  }
  0x45   : > { %4085 = dma.done.wait (%p3519_p9), [#allocation3], 1024  }
  0x46   : > { %4087 = vsyncadd (%p3519_p9), [#allocation3], 4294966272 }
  0x47   : > { %4089 = dma.done.wait (%p3519_p9), [#allocation6], 2048  }
  0x48   : > { %4091 = vsyncadd (%p3519_p9), [#allocation6], 4294965248 }
  0x49   : > { %4093 = dma.done.wait (%p3519_p9), [#allocation9], 2048  }
  0x4a   : > { %4095 = vsyncadd (%p3519_p9), [#allocation9], 4294965248 }
  0x4b   : > { %4097 = dma.done.wait (%p3519_p9), [#allocation12], 2048  }
  0x4c   : > { %4099 = vsyncadd (%p3519_p9), [#allocation12], 4294965248 }
  0x4d   : > { %4101 = dma.done.wait (%p3519_p9), [#allocation15], 2048  }
  0x4e   : > { %4103 = vsyncadd (%p3519_p9), [#allocation15], 4294965248  ;;  %s4417_s26 = sshll.u32 %s4282_s5, 3  ;;  %v4139_v0 = vmov 0   ;;  %s4881_s2 = sld [smem:[#allocation34_spill]]  ;;  %v3352_v49 = vld [vmem:[#allocation2 + $0x38] sm:$0xff] }
  0x4f   : > { %3584 = vset.pattern.permute.xlu1 %v4139_v0  ;;  %3583 = vset.pattern.permute.xlu0 %v4139_v0  ;;  %p882_p13 = scmp.lt.s32.totalorder %s4417_s26, 15  ;;  %s4882_s24 = sld [smem:[#allocation35_spill]]  ;;  %v3351_v50 = vld [vmem:[#allocation2 + $0x30] sm:$0xff]  ;;  %v3350_v51 = vld [vmem:[#allocation2 + $0x28] sm:$0xff]  ;;  %v3349_v52 = vld [vmem:[#allocation2 + $0x20] sm:$0xff] }
  0x50   : > { %3585 = vset.pattern.permute.xlu2 %v4139_v0  ;;  %s4884_s14 = sld [smem:[#allocation33_spill]]  ;;  %1298 = vmatpush.bf16.msra.mxu1 %v3352_v49  ;;  %v3348_v54 = vld [vmem:[#allocation2 + $0x18] sm:$0xff]  ;;  %v3347_v58 = vld [vmem:[#allocation2 + $0x10] sm:$0xff]  ;;  %v3346_v60 = vld [vmem:[#allocation2 + $0x8] sm:$0xff]  ;;  %s4731_s25 = sand.u32 1, %s4118_s30  }
  0x51   : > { %s4421_s29 = scalar_select %p882_p13, %s4417_s26, 15  ;;  %v3345_v0 = vld [vmem:[#allocation2] sm:$0xff] }
  0x52   : > { %s4885_s4 = sld [smem:[#allocation36_spill]]  ;;  %s2726_s1 = scalar_lea.sflag [#allocation19], %s4731_s25 }
  0x53   : > { %s2974_s3 = sshll.u32 %s4421_s29, 3  ;;  %s4892_s0 = sld [smem:[#allocation38_spill]] }
  0x54   : > { %s891_s6 = scalar_lea.vmem %s4881_s2, %s2974_s3  ;;  %1299 = vmatpush.bf16.msra.mxu1 %v3351_v50  ;;  %s4895_s5 = sld [smem:[#allocation40_spill]] }
  0x55   : > { %v911_v1 = vld [vmem:[%s891_s6 + $0x10] sm:$0xff]  ;;  %v909_v2 = vld [vmem:[%s891_s6] sm:$0xff]  ;;  %s4883_s23 = smov %s4882_s24  ;;  %v3344_v4 = vld [vmem:[%s4882_s24 + $0x38] sm:$0xff]  ;;  %s2972_s24 = sshll.u32 %s4421_s29, 2 }
  0x56   : > { %v913_v3 = vld [vmem:[%s891_s6 + $0x20] sm:$0xff]  ;;  %929 = vperm.xlu1 %3584, %v911_v1   ;;  %919 = vperm.xlu0 %3583, %v909_v2   ;;  %v912_v5 = vld [vmem:[%s891_s6 + $0x18] sm:$0xff]  ;;  %v910_v6 = vld [vmem:[%s891_s6 + $0x8] sm:$0xff]  ;;  %s885_s10 = scalar_lea.vmem %s4884_s14, %s2972_s24  ;;  %s4851_s14 = sshll.u32 %s4731_s25, 3 }
  0x57   : > { %939 = vperm.xlu2 %3585, %v913_v3   ;;  %3436 = vmatpush.bf16.msra.mxu3 %v3344_v4  ;;  %v3343_v7 = vld [vmem:[%s4883_s23 + $0x30] sm:$0xff]  ;;  %v914_v8 = vld [vmem:[%s891_s6 + $0x28] sm:$0xff]  ;;  %v3341_v10 = vld [vmem:[%s4883_s23 + $0x20] sm:$0xff]  ;;  %s4900_s21 = sld [smem:[#allocation46_spill]] }
  0x58   : > { %1037 = vmatpush.bf16.msra.mxu0 %v3344_v4  ;;  %v3342_v9 = vld [vmem:[%s4883_s23 + $0x28] sm:$0xff]  ;;  %v916_v11 = vld [vmem:[%s891_s6 + $0x38] sm:$0xff]  ;;  %v915_v12 = vld [vmem:[%s891_s6 + $0x30] sm:$0xff]  ;;  %1300 = vmatpush.bf16.msra.mxu1 %v3350_v51 }
  0x59   : > { %v3340_v13 = vld [vmem:[%s4883_s23 + $0x18] sm:$0xff]  ;;  %v3339_v14 = vld [vmem:[%s4883_s23 + $0x10] sm:$0xff]  ;;  %v3338_v15 = vld [vmem:[%s4883_s23 + $0x8] sm:$0xff] }
  0x5a   : > { %v3337_v16 = vld [vmem:[%s4883_s23] sm:$0xff]  ;;  %v3434_v18 = vld [vmem:[%s885_s10 + $0x10] sm:$0xff]   ;;  %v3435_v34 = vld [vmem:[%s885_s10 + $0x18] sm:$0xff]  }
  0x5b   : > { %3437 = vmatpush.bf16.msra.mxu3 %v3343_v7  ;;  %v3427_v19 = vunpack.c.l.bf16 %v3434_v18  ;;  %v3428_v20 = vunpack.c.h.bf16 %v3434_v18  ;;  %v3418_v27 = vld [vmem:[%s885_s10] sm:$0xff]   ;;  %v3432_v36 = vunpack.c.h.bf16 %v3435_v34  ;;  %v3431_v37 = vunpack.c.l.bf16 %v3435_v34  ;;  %v3433_v38 = vld [vmem:[%s885_s10 + $0x8] sm:$0xff]   ;;  %s4747_s10 = scalar_lea.vmem [#allocation18], %s4851_s14 }
  0x5c   : > { %1038 = vmatpush.bf16.msra.mxu0 %v3343_v7  ;;  %v3419_v28 = vunpack.c.l.bf16 %v3418_v27  ;;  %v3420_v29 = vunpack.c.h.bf16 %v3418_v27  ;;  %v3423_v43 = vunpack.c.l.bf16 %v3433_v38  ;;  %v3424_v44 = vunpack.c.h.bf16 %v3433_v38  ;;  %1301 = vmatpush.bf16.msra.mxu1 %v3349_v52  ;;  %v4458_v53 = vld [vmem:[%s4885_s4] ss:$0 sm:$0xff]  ;;  %s2752_s28 = sshll.u32 %s4747_s10, 4  ;;  %s2753_s28 = int_to_ptr.vmem [resolvable:$true] %s2752_s28 }
  0x5d   : > { %s2750_s24 = scalar_lea.hbm %s4900_s21, %s4417_s26  ;;  %s4032_s22 = scalar_lea.hbm %s4900_s21, 16 }
  0x5e   : > { %934 = vperm.xlu1 %3584, %v912_v5   ;;  %924 = vperm.xlu0 %3583, %v910_v6   ;;  %s2754_s29 = sshll.u32 %s2750_s24, 4  ;;  %s2755_s29 = int_to_ptr.hbm [resolvable:$true] %s2754_s29 }
  0x5f   : > { %944 = vperm.xlu2 %3585, %v914_v8   ;;  %3438 = vmatpush.bf16.msra.mxu3 %v3342_v9  ;;  %s4026_s4 = sshra.s32 %s2755_s29, 4  ;;  %s4027_s4 = int_to_ptr.hbm [resolvable:$true] %s4026_s4 }
  0x60   : > { %1039 = vmatpush.bf16.msra.mxu0 %v3342_v9  ;;  %1302 = vmatpush.bf16.msra.mxu1 %v3348_v54  ;;  %s4028_s27 = scalar_lea.hbm %s4027_s4, 8  ;;  %p4033_p3 = scmp.lt.s32.totalorder %s4027_s4, %s4900_s21 }
  0x61   : > { %p4029_p0 = scmp.ne.s32.totalorder %s4027_s4, %s4028_s27  ;;  %p4034_p4 = scmp.lt.s32.totalorder %s4032_s22, %s4028_s27 }
  0x63   : > { %3439 = vmatpush.bf16.msra.mxu3 %v3341_v10  ;;  %p4030_p1 = pnand %p4029_p0, %p4299_p5  ;;  %p4035_p7 = por %p4034_p4, %p4033_p3 }
  0x64   : > { %1040 = vmatpush.bf16.msra.mxu0 %v3341_v10  ;;  %1303 = vmatpush.bf16.msra.mxu1 %v3347_v58 }
  0x65   : > { %p4031_p2 = pneg %p4030_p1 }
  0x66   : > { %954 = vperm.xlu1 %3584, %v916_v11   ;;  %949 = vperm.xlu0 %3583, %v915_v12  }
  0x67   : > { %3440 = vmatpush.bf16.msra.mxu3 %v3340_v13  ;;  %p4036_p8 = pnand %p4035_p7, %p4031_p2 }
  0x68   : > { %1041 = vmatpush.bf16.msra.mxu0 %v3340_v13  ;;  %1304 = vmatpush.bf16.msra.mxu1 %v3346_v60 }
  0x6b   : > { %3441 = vmatpush.bf16.msra.mxu3 %v3339_v14 }
  0x6c   : > { %1042 = vmatpush.bf16.msra.mxu0 %v3339_v14  ;;  %1305 = vmatpush.bf16.msra.mxu1 %v3345_v0 }
  0x6f   : > { %3442 = vmatpush.bf16.msra.mxu3 %v3338_v15 }
  0x70   : > { %1043 = vmatpush.bf16.msra.mxu0 %v3338_v15 }
  0x73   : > { %3443 = vmatpush.bf16.msra.mxu3 %v3337_v16 }
  0x74   : > { %1044 = vmatpush.bf16.msra.mxu0 %v3337_v16 }
  0xb1   : > { %v940_v17 = vpop.permute.xlu2 %939 }
  0xb2   : > { %v961_v21 = vmul.f32 %v3427_v19, %v940_v17 }
  0xb9   : > { %v945_v22 = vpop.permute.xlu2 %944 }
  0xba   : > { %v962_v23 = vmul.f32 %v3428_v20, %v945_v22 }
  0xbc   : > { %v967_v24 = vpack.c.bf16 %v962_v23, %v961_v21 }
  0xbe   : > { %1055 = vmatmul.bf16.vlgmr.msra.gmra.mxu3 %v967_v24 }
  0xc8   : > { %v930_v25 = vpop.permute.xlu1 %929  ;;  %v920_v26 = vpop.permute.xlu0 %919 }
  0xc9   : > { %v957_v32 = vmul.f32 %v3419_v28, %v920_v26  ;;  %v959_v46 = vmul.f32 %v3423_v43, %v930_v25 }
  0xd0   : > { %v935_v30 = vpop.permute.xlu1 %934  ;;  %v925_v31 = vpop.permute.xlu0 %924 }
  0xd1   : > { %v958_v33 = vmul.f32 %v3420_v29, %v925_v31  ;;  %v960_v47 = vmul.f32 %v3424_v44, %v935_v30 }
  0xd3   : > { %v965_v35 = vpack.c.bf16 %v958_v33, %v957_v32  ;;  %v966_v48 = vpack.c.bf16 %v960_v47, %v959_v46 }
  0xd5   : > { %1045 = vmatmul.bf16.vlgmr.msra.gmra.mxu0 %v965_v35 }
  0xd8   : > { %v955_v39 = vpop.permute.xlu1 %954  ;;  %v950_v40 = vpop.permute.xlu0 %949 }
  0xd9   : > { %v964_v41 = vmul.f32 %v3432_v36, %v955_v39  ;;  %v963_v42 = vmul.f32 %v3431_v37, %v950_v40 }
  0xdb   : > { %v968_v45 = vpack.c.bf16 %v964_v41, %v963_v42 }
  0xdd   : > { %1060 = vmatmul.bf16.gmra.mxu3 %v968_v45 }
  0xe5   : > { %1050 = vmatmul.bf16.gmra.mxu0 %v966_v48 }
 0x141   : > { %v1056_v59 = vpop.f32.mrf.mxu3 }
 0x142   : > { %v4472_v6 = vadd.f32 %v4458_v53, %v1056_v59 }
 0x144   : > { %v3011_v12 = vmul.f32 -1.442695, %v4472_v6 }
 0x149   : > { %v1058_v3 = vpop.f32.mrf.mxu3 }
 0x14a   : > { %v4475_v8 = vadd.f32 %v4458_v53, %v1058_v3 }
 0x14c   : > { %v3012_v14 = vmul.f32 -1.442695, %v4475_v8 }
 0x152   : > { %v1046_v55 = vpop.f32.mrf.mxu0 }
 0x153   : > { %v4461_v56 = vadd.f32 %v4458_v53, %v1046_v55 }
 0x155   : > { %v3007_v57 = vmul.f32 -1.442695, %v4461_v56 }
 0x157   : > { %3596 = vpow2.f32 %v3007_v57 }
 0x15a   : > { %v1048_v61 = vpop.f32.mrf.mxu0 }
 0x15b   : > { %v4465_v62 = vadd.f32 %v4458_v53, %v1048_v61 }
 0x15d   : > { %v3008_v63 = vmul.f32 -1.442695, %v4465_v62  ;;  %v3597_v1 = vpop.eup %3596 }
 0x15e   : > { %v1090_v2 = vadd.f32 1.0, %v3597_v1 }
 0x15f   : > { %3598 = vpow2.f32 %v3008_v63 }
 0x160   : > { %3600 = vrcp.f32 %v1090_v2  ;;  %v1061_v16 = vpop.f32.mrf.mxu3  ;;  %v1109_v26 = vand.u32 2147483648, %v1090_v2  ;;  %vm1103_vm1 = vweird.f32 %v1090_v2  ;;  %v1107_v27 = vand.u32 2147483647, %v1090_v2 }
 0x161   : > { %v4504_v51 = vadd.f32 %v4458_v53, %v1061_v16 }
 0x162   : > { %v1051_v4 = vpop.f32.mrf.mxu0  ;;  %v1110_v36 = vor.u32 1.1754944e-38, %v1109_v26  ;;  %vm1108_vm4 = vcmp.eq.f32.partialorder %v1107_v27, 8.507059e+37 }
 0x163   : > { %v4469_v5 = vadd.f32 %v4458_v53, %v1051_v4  ;;  %v3013_v58 = vmul.f32 -1.442695, %v4504_v51 }
 0x165   : > { %v3599_v7 = vpop.eup %3598  ;;  %v3009_v9 = vmul.f32 -1.442695, %v4469_v5 }
 0x166   : > { %v1091_v10 = vadd.f32 1.0, %v3599_v7  ;;  %v3601_v11 = vpop.eup %3600  ;;  %v3358_v7 = vld [vmem:[#allocation5 + $0x28] sm:$0xff] }
 0x167   : > { %3602 = vpow2.f32 %v3009_v9  ;;  %v1099_v13 = vmul.f32 %v3601_v11, %v1090_v2  ;;  %vm1104_vm0 = vweird.f32 %v3601_v11 }
 0x168   : > { %3604 = vrcp.f32 %v1091_v10  ;;  %vm4487_vm2 = vmor %vm1103_vm1, %vm1104_vm0  ;;  %v1122_v31 = vand.u32 2147483647, %v1091_v10  ;;  %v1124_v32 = vand.u32 2147483648, %v1091_v10  ;;  %v1063_v37 = vpop.f32.mrf.mxu3  ;;  %vm1118_vm5 = vweird.f32 %v1091_v10 }
 0x169   : > { %v1100_v15 = vsub.f32 1.0, %v1099_v13  ;;  %3606 = vpow2.f32 %v3011_v12  ;;  %v4499_v46 = vadd.f32 %v4458_v53, %v1063_v37 }
 0x16a   : > { %v1053_v17 = vpop.f32.mrf.mxu0  ;;  %3608 = vpow2.f32 %v3012_v14  ;;  %v1125_v43 = vor.u32 1.1754944e-38, %v1124_v32  ;;  %vm1123_vm7 = vcmp.eq.f32.partialorder %v1122_v31, 8.507059e+37 }
 0x16b   : > { %v4481_v18 = vadd.f32 %v4458_v53, %v1053_v17  ;;  %v1101_v19 = vmul.f32 %v3601_v11, %v1100_v15  ;;  %v3014_v55 = vmul.f32 -1.442695, %v4499_v46 }
 0x16d   : > { %v3603_v20 = vpop.eup %3602  ;;  %v1102_v23 = vadd.f32 %v3601_v11, %v1101_v19  ;;  %v3010_v25 = vmul.f32 -1.442695, %v4481_v18 }
 0x16e   : > { %v3605_v21 = vpop.eup %3604  ;;  %v4483_v22 = vadd.f32 1.0, %v3603_v20 }
 0x16f   : > { %v1114_v24 = vmul.f32 %v3605_v21, %v1091_v10  ;;  %v3607_v29 = vpop.eup %3606  ;;  %v1106_v34 = vsel %vm4487_vm2, %v3601_v11, %v1102_v23  ;;  %vm1119_vm3 = vweird.f32 %v3605_v21 }
 0x170   : > { %3610 = vrcp.f32 %v4483_v22  ;;  %v3609_v33 = vpop.eup %3608  ;;  %v4493_v40 = vadd.f32 1.0, %v3607_v29  ;;  %v1111_v42 = vsel %vm1108_vm4, %v1110_v36, %v1106_v34  ;;  %vm1120_vm6 = vmor %vm1118_vm5, %vm1119_vm3  ;;  %v1139_v0 = vand.u32 2147483648, %v4483_v22 }
 0x171   : > { %v1115_v28 = vsub.f32 1.0, %v1114_v24  ;;  %3612 = vpow2.f32 %v3010_v25  ;;  %v4495_v41 = vadd.f32 1.0, %v3609_v33  ;;  %v1218_v49 = vmul.f32 %v1111_v42, %v4461_v56 }
 0x172   : > { %3614 = vrcp.f32 %v4493_v40  ;;  %vm1133_vm9 = vweird.f32 %v4483_v22  ;;  %v1137_v3 = vand.u32 2147483647, %v4483_v22  ;;  %v1140_v15 = vor.u32 1.1754944e-38, %v1139_v0 }
 0x173   : > { %v1116_v35 = vmul.f32 %v3605_v21, %v1115_v28  ;;  %3616 = vrcp.f32 %v4495_v41  ;;  %vm1163_vm0 = vweird.f32 %v4493_v40  ;;  %vm1178_vm2 = vweird.f32 %v4495_v41 }
 0x174   : > { %vm1138_vm12 = vcmp.eq.f32.partialorder %v1137_v3, 8.507059e+37  ;;  %v1167_v30 = vand.u32 2147483647, %v4493_v40  ;;  %v1169_v31 = vand.u32 2147483648, %v4493_v40  ;;  %v1184_v32 = vand.u32 2147483648, %v4495_v41  ;;  %v3360_v3 = vld [vmem:[#allocation5 + $0x38] sm:$0xff] }
 0x175   : > { %v1117_v38 = vadd.f32 %v3605_v21, %v1116_v35  ;;  %v1182_v34 = vand.u32 2147483647, %v4495_v41  ;;  %1559 = vmatpush.bf16.msra.mxu2 %v3360_v3 }
 0x176   : > { %v3611_v39 = vpop.eup %3610  ;;  %v1170_v37 = vor.u32 1.1754944e-38, %v1169_v31 }
 0x177   : > { %v1121_v44 = vsel %vm1120_vm6, %v3605_v21, %v1117_v38  ;;  %v1129_v45 = vmul.f32 %v3611_v39, %v4483_v22  ;;  %v3613_v48 = vpop.eup %3612  ;;  %vm1134_vm8 = vweird.f32 %v3611_v39  ;;  %vm1168_vm6 = vcmp.eq.f32.partialorder %v1167_v30, 8.507059e+37 }
 0x178   : > { %v1126_v47 = vsel %vm1123_vm7, %v1125_v43, %v1121_v44  ;;  %v1093_v52 = vadd.f32 1.0, %v3613_v48  ;;  %v4510_v56 = vpop.eup %3614  ;;  %vm4521_vm10 = vmor %vm1133_vm9, %vm1134_vm8  ;;  %v1185_v38 = vor.u32 1.1754944e-38, %v1184_v32  ;;  %vm1183_vm7 = vcmp.eq.f32.partialorder %v1182_v34, 8.507059e+37 }
 0x179   : > { %v1219_v50 = vmul.f32 %v1126_v47, %v4465_v62  ;;  %v1130_v54 = vsub.f32 1.0, %v1129_v45  ;;  %v4512_v60 = vpop.eup %3616  ;;  %v1159_v63 = vmul.f32 %v4510_v56, %v4493_v40  ;;  %vm1164_vm1 = vweird.f32 %v4510_v56 }
 0x17a   : > { %3618 = vrcp.f32 %v1093_v52  ;;  %v1174_v2 = vmul.f32 %v4512_v60, %v4495_v41  ;;  %v1154_v9 = vand.u32 2147483648, %v1093_v52  ;;  %v1152_v13 = vand.u32 2147483647, %v1093_v52  ;;  %vm4545_vm4 = vmor %vm1163_vm0, %vm1164_vm1 }
 0x17b   : > { %v1226_v57 = vpack.c.bf16 %v1219_v50, %v1218_v49  ;;  %v1131_v59 = vmul.f32 %v3611_v39, %v1130_v54  ;;  %3620 = vpow2.f32 %v3014_v55  ;;  %v1160_v14 = vsub.f32 1.0, %v1159_v63 }
 0x17c   : > { %3622 = vpow2.f32 %v3013_v58  ;;  %v1175_v17 = vsub.f32 1.0, %v1174_v2  ;;  %vm1148_vm13 = vweird.f32 %v1093_v52  ;;  %v1155_v22 = vor.u32 1.1754944e-38, %v1154_v9  ;;  %v3357_v9 = vld [vmem:[#allocation5 + $0x20] sm:$0xff] }
 0x17d   : > { %1306 = vmatmul.bf16.vlgmr.msra.gmra.mxu1 %v1226_v57  ;;  %v1132_v61 = vadd.f32 %v3611_v39, %v1131_v59  ;;  %vm1153_vm15 = vcmp.eq.f32.partialorder %v1152_v13, 8.507059e+37  ;;  %v1161_v25 = vmul.f32 %v4510_v56, %v1160_v14  ;;  %vm1179_vm3 = vweird.f32 %v4512_v60  ;;  %v3355_v13 = vld [vmem:[#allocation5 + $0x10] sm:$0xff]  ;;  %v3354_v14 = vld [vmem:[#allocation5 + $0x8] sm:$0xff] }
 0x17e   : > { %v1176_v26 = vmul.f32 %v4512_v60, %v1175_v17  ;;  %vm1180_vm5 = vmor %vm1178_vm2, %vm1179_vm3 }
 0x17f   : > { %v1136_v11 = vsel %vm4521_vm10, %v3611_v39, %v1132_v61 }
 0x180   : > { %v3619_v53 = vpop.eup %3618  ;;  %v1141_v21 = vsel %vm1138_vm12, %v1140_v15, %v1136_v11  ;;  %v1177_v33 = vadd.f32 %v4512_v60, %v1176_v26  ;;  %v3356_v11 = vld [vmem:[#allocation5 + $0x18] sm:$0xff] }
 0x181   : > { %v1144_v62 = vmul.f32 %v3619_v53, %v1093_v52  ;;  %v3621_v1 = vpop.eup %3620  ;;  %vm1149_vm11 = vweird.f32 %v3619_v53  ;;  %v1220_v27 = vmul.f32 %v1141_v21, %v4469_v5  ;;  %v1162_v5 = vadd.f32 %v4510_v56, %v1161_v25 }
 0x182   : > { %v3623_v10 = vpop.eup %3622  ;;  %v4527_v16 = vadd.f32 1.0, %v3621_v1  ;;  %vm1150_vm14 = vmor %vm1148_vm13, %vm1149_vm11  ;;  %v1181_v40 = vsel %vm1180_vm5, %v4512_v60, %v1177_v33 }
 0x183   : > { %v1145_v4 = vsub.f32 1.0, %v1144_v62  ;;  %v4529_v20 = vadd.f32 1.0, %v3623_v10  ;;  %v1166_v39 = vsel %vm4545_vm4, %v4510_v56, %v1162_v5  ;;  %v1186_v41 = vsel %vm1183_vm7, %v1185_v38, %v1181_v40  ;;  %v4570_v10 = vld [vmem:[%s4892_s0] ss:$0 sm:$0xff] }
 0x184   : > { %3624 = vrcp.f32 %v4527_v16  ;;  %v1171_v44 = vsel %vm1168_vm6, %v1170_v37, %v1166_v39  ;;  %v1223_v48 = vmul.f32 %v1186_v41, %v4475_v8  ;;  %v1214_v57 = vand.u32 2147483648, %v4527_v16 }
 0x185   : > { %v1146_v12 = vmul.f32 %v3619_v53, %v1145_v4  ;;  %3626 = vrcp.f32 %v4529_v20  ;;  %v1222_v47 = vmul.f32 %v1171_v44, %v4472_v6  ;;  %vm1208_vm10 = vweird.f32 %v4527_v16  ;;  %v3359_v4 = vld [vmem:[#allocation5 + $0x30] sm:$0xff] }
 0x186   : > { %v1212_v59 = vand.u32 2147483647, %v4527_v16  ;;  %v1199_v56 = vand.u32 2147483648, %v4529_v20  ;;  %vm1193_vm12 = vweird.f32 %v4529_v20  ;;  %v1197_v6 = vand.u32 2147483647, %v4529_v20  ;;  %1560 = vmatpush.bf16.msra.mxu2 %v3359_v4 }
 0x187   : > { %v1147_v19 = vadd.f32 %v3619_v53, %v1146_v12  ;;  %v1228_v54 = vpack.c.bf16 %v1223_v48, %v1222_v47  ;;  %v1215_v60 = vor.u32 1.1754944e-38, %v1214_v57 }
 0x188   : > { %v1200_v61 = vor.u32 1.1754944e-38, %v1199_v56 }
 0x189   : > { %v1151_v23 = vsel %vm1150_vm14, %v3619_v53, %v1147_v19  ;;  %vm1213_vm14 = vcmp.eq.f32.partialorder %v1212_v59, 8.507059e+37 }
 0x18a   : > { %v1156_v24 = vsel %vm1153_vm15, %v1155_v22, %v1151_v23  ;;  %v3625_v35 = vpop.eup %3624  ;;  %vm1198_vm15 = vcmp.eq.f32.partialorder %v1197_v6, 8.507059e+37  ;;  %1561 = vmatpush.bf16.msra.mxu2 %v3358_v7 }
 0x18b   : > { %v1221_v28 = vmul.f32 %v1156_v24, %v4481_v18  ;;  %v3627_v36 = vpop.eup %3626  ;;  %v1204_v42 = vmul.f32 %v3625_v35, %v4527_v16  ;;  %vm1209_vm8 = vweird.f32 %v3625_v35 }
 0x18c   : > { %v1189_v43 = vmul.f32 %v3627_v36, %v4529_v20  ;;  %vm1194_vm9 = vweird.f32 %v3627_v36  ;;  %vm1210_vm11 = vmor %vm1208_vm10, %vm1209_vm8  ;;  %v3353_v20 = vld [vmem:[#allocation5] sm:$0xff] }
 0x18d   : > { %v1227_v29 = vpack.c.bf16 %v1221_v28, %v1220_v27  ;;  %v1205_v45 = vsub.f32 1.0, %v1204_v42  ;;  %vm1195_vm13 = vmor %vm1193_vm12, %vm1194_vm9 }
 0x18e   : > { %v1190_v49 = vsub.f32 1.0, %v1189_v43  ;;  %1562 = vmatpush.bf16.msra.mxu2 %v3357_v9 }
 0x18f   : > { %1311 = vmatmul.bf16.gmra.mxu1 %v1227_v29  ;;  %v1206_v50 = vmul.f32 %v3625_v35, %v1205_v45 }
 0x190   : > { %v1191_v52 = vmul.f32 %v3627_v36, %v1190_v49 }
 0x191   : > { %v1207_v55 = vadd.f32 %v3625_v35, %v1206_v50 }
 0x192   : > { %v1192_v58 = vadd.f32 %v3627_v36, %v1191_v52  ;;  %1563 = vmatpush.bf16.msra.mxu2 %v3356_v11 }
 0x193   : > { %v1211_v8 = vsel %vm1210_vm11, %v3625_v35, %v1207_v55 }
 0x194   : > { %v1196_v53 = vsel %vm1195_vm13, %v3627_v36, %v1192_v58  ;;  %v1216_v62 = vsel %vm1213_vm14, %v1215_v60, %v1211_v8 }
 0x195   : > { %v1201_v63 = vsel %vm1198_vm15, %v1200_v61, %v1196_v53  ;;  %v1225_v0 = vmul.f32 %v1216_v62, %v4499_v46 }
 0x196   : > { %v1224_v1 = vmul.f32 %v1201_v63, %v4504_v51  ;;  %1564 = vmatpush.bf16.msra.mxu2 %v3355_v13 }
 0x198   : > { %v1229_v2 = vpack.c.bf16 %v1225_v0, %v1224_v1 }
 0x19a   : > { %1565 = vmatpush.bf16.msra.mxu2 %v3354_v14 }
 0x19e   : > { %1566 = vmatpush.bf16.msra.mxu2 %v3353_v20 }
 0x19f   : > { %1316 = vmatmul.bf16.gmra.mxu1 %v1228_v54 }
 0x1af   : > { %1321 = vmatmul.bf16.gmra.mxu1 %v1229_v2 }
 0x1fa   : > { %v1307_v12 = vpop.f32.mrf.mxu1 }
 0x1fb   : > { %v1308_v46 = vadd.f32 %v4570_v10, %v1307_v12 }
 0x1fd   : > { %v3047_v51 = vmul.f32 -1.442695, %v1308_v46 }
 0x1ff   : > { %3628 = vpow2.f32 %v3047_v51 }
 0x202   : > { %v1309_v15 = vpop.f32.mrf.mxu1 }
 0x203   : > { %v1310_v16 = vadd.f32 %v4570_v10, %v1309_v15 }
 0x205   : > { %v3629_v17 = vpop.eup %3628  ;;  %v3048_v19 = vmul.f32 -1.442695, %v1310_v16 }
 0x206   : > { %v1351_v21 = vadd.f32 1.0, %v3629_v17 }
 0x207   : > { %3630 = vpow2.f32 %v3048_v19 }
 0x208   : > { %3632 = vrcp.f32 %v1351_v21  ;;  %v1370_v34 = vand.u32 2147483648, %v1351_v21  ;;  %vm1364_vm1 = vweird.f32 %v1351_v21  ;;  %v1368_v36 = vand.u32 2147483647, %v1351_v21 }
 0x20a   : > { %v1371_v41 = vor.u32 1.1754944e-38, %v1370_v34  ;;  %vm1369_vm4 = vcmp.eq.f32.partialorder %v1368_v36, 8.507059e+37 }
 0x20c   : > { %v1312_v25 = vpop.f32.mrf.mxu1 }
 0x20d   : > { %v3631_v22 = vpop.eup %3630  ;;  %v4575_v27 = vadd.f32 %v4570_v10, %v1312_v25 }
 0x20e   : > { %v3633_v23 = vpop.eup %3632  ;;  %v1352_v24 = vadd.f32 1.0, %v3631_v22 }
 0x20f   : > { %v1360_v26 = vmul.f32 %v3633_v23, %v1351_v21  ;;  %v3049_v29 = vmul.f32 -1.442695, %v4575_v27  ;;  %vm1365_vm0 = vweird.f32 %v3633_v23 }
 0x210   : > { %3634 = vrcp.f32 %v1352_v24  ;;  %vm1366_vm2 = vmor %vm1364_vm1, %vm1365_vm0  ;;  %v1383_v39 = vand.u32 2147483647, %v1352_v24  ;;  %v1385_v40 = vand.u32 2147483648, %v1352_v24  ;;  %vm1379_vm5 = vweird.f32 %v1352_v24 }
 0x211   : > { %v1361_v28 = vsub.f32 1.0, %v1360_v26  ;;  %3636 = vpow2.f32 %v3049_v29 }
 0x212   : > { %v1386_v48 = vor.u32 1.1754944e-38, %v1385_v40  ;;  %vm1384_vm7 = vcmp.eq.f32.partialorder %v1383_v39, 8.507059e+37 }
 0x213   : > { %v1362_v30 = vmul.f32 %v3633_v23, %v1361_v28 }
 0x214   : > { %v1314_v32 = vpop.f32.mrf.mxu1 }
 0x215   : > { %v1363_v5 = vadd.f32 %v3633_v23, %v1362_v30  ;;  %v4579_v33 = vadd.f32 %v4570_v10, %v1314_v32 }
 0x216   : > { %v3635_v31 = vpop.eup %3634 }
 0x217   : > { %v1375_v18 = vmul.f32 %v3635_v31, %v1352_v24  ;;  %v3637_v35 = vpop.eup %3636  ;;  %v3050_v38 = vmul.f32 -1.442695, %v4579_v33  ;;  %v1367_v43 = vsel %vm1366_vm2, %v3633_v23, %v1363_v5  ;;  %vm1380_vm3 = vweird.f32 %v3635_v31 }
 0x218   : > { %v1353_v42 = vadd.f32 1.0, %v3637_v35  ;;  %v1372_v47 = vsel %vm1369_vm4, %v1371_v41, %v1367_v43  ;;  %vm1381_vm6 = vmor %vm1379_vm5, %vm1380_vm3 }
 0x219   : > { %v1376_v37 = vsub.f32 1.0, %v1375_v18  ;;  %3638 = vpow2.f32 %v3050_v38  ;;  %v1479_v57 = vmul.f32 %v1372_v47, %v1308_v46 }
 0x21a   : > { %3640 = vrcp.f32 %v1353_v42  ;;  %v1400_v9 = vand.u32 2147483648, %v1353_v42  ;;  %vm1394_vm9 = vweird.f32 %v1353_v42  ;;  %v1398_v11 = vand.u32 2147483647, %v1353_v42 }
 0x21b   : > { %v1377_v44 = vmul.f32 %v3635_v31, %v1376_v37 }
 0x21c   : > { %v1317_v49 = vpop.f32.mrf.mxu1  ;;  %v1401_v19 = vor.u32 1.1754944e-38, %v1400_v9  ;;  %vm1399_vm12 = vcmp.eq.f32.partialorder %v1398_v11, 8.507059e+37 }
 0x21d   : > { %v1378_v45 = vadd.f32 %v3635_v31, %v1377_v44  ;;  %v4583_v52 = vadd.f32 %v4570_v10, %v1317_v49 }
 0x21f   : > { %v1382_v50 = vsel %vm1381_vm6, %v3635_v31, %v1378_v45  ;;  %v3639_v55 = vpop.eup %3638  ;;  %v3051_v59 = vmul.f32 -1.442695, %v4583_v52 }
 0x220   : > { %v1387_v54 = vsel %vm1384_vm7, %v1386_v48, %v1382_v50  ;;  %v3641_v56 = vpop.eup %3640  ;;  %v1354_v6 = vadd.f32 1.0, %v3639_v55 }
 0x221   : > { %v1480_v58 = vmul.f32 %v1387_v54, %v1310_v16  ;;  %v1390_v8 = vmul.f32 %v3641_v56, %v1353_v42  ;;  %3642 = vpow2.f32 %v3051_v59  ;;  %vm1395_vm8 = vweird.f32 %v3641_v56 }
 0x222   : > { %3644 = vrcp.f32 %v1354_v6  ;;  %vm4593_vm10 = vmor %vm1394_vm9, %vm1395_vm8  ;;  %v1413_v51 = vand.u32 2147483647, %v1354_v6  ;;  %v1415_v13 = vand.u32 2147483648, %v1354_v6  ;;  %vm1409_vm13 = vweird.f32 %v1354_v6 }
 0x223   : > { %v1487_v60 = vpack.c.bf16 %v1480_v58, %v1479_v57  ;;  %v1391_v53 = vsub.f32 1.0, %v1390_v8 }
 0x224   : > { %v1319_v61 = vpop.f32.mrf.mxu1  ;;  %v1416_v25 = vor.u32 1.1754944e-38, %v1415_v13  ;;  %vm1414_vm15 = vcmp.eq.f32.partialorder %v1413_v51, 8.507059e+37 }
 0x225   : > { %1567 = vmatmul.bf16.vlgmr.msra.gmra.mxu2 %v1487_v60  ;;  %v1392_v62 = vmul.f32 %v3641_v56, %v1391_v53  ;;  %v4587_v63 = vadd.f32 %v4570_v10, %v1319_v61 }
 0x227   : > { %v3643_v0 = vpop.eup %3642  ;;  %v3052_v1 = vmul.f32 -1.442695, %v4587_v63  ;;  %v1393_v4 = vadd.f32 %v3641_v56, %v1392_v62 }
 0x228   : > { %v3645_v2 = vpop.eup %3644  ;;  %v4590_v3 = vadd.f32 1.0, %v3643_v0 }
 0x229   : > { %v1405_v7 = vmul.f32 %v3645_v2, %v1354_v6  ;;  %3646 = vpow2.f32 %v3052_v1  ;;  %v1397_v15 = vsel %vm4593_vm10, %v3641_v56, %v1393_v4  ;;  %vm1410_vm11 = vweird.f32 %v3645_v2 }
 0x22a   : > { %3648 = vrcp.f32 %v4590_v3  ;;  %v1402_v24 = vsel %vm1399_vm12, %v1401_v19, %v1397_v15  ;;  %vm1411_vm14 = vmor %vm1409_vm13, %vm1410_vm11  ;;  %vm1424_vm1 = vweird.f32 %v4590_v3 }
 0x22b   : > { %v1406_v12 = vsub.f32 1.0, %v1405_v7  ;;  %v1481_v31 = vmul.f32 %v1402_v24, %v4575_v27  ;;  %v1430_v27 = vand.u32 2147483648, %v4590_v3  ;;  %v3365_v24 = vld [vmem:[#allocation7 + $0x20] sm:$0xff] }
 0x22c   : > { %v1322_v14 = vpop.f32.mrf.mxu1 }
 0x22d   : > { %v1407_v16 = vmul.f32 %v3645_v2, %v1406_v12  ;;  %v4600_v17 = vadd.f32 %v4570_v10, %v1322_v14  ;;  %v1431_v48 = vor.u32 1.1754944e-38, %v1430_v27 }
 0x22f   : > { %v3647_v20 = vpop.eup %3646  ;;  %v1408_v21 = vadd.f32 %v3645_v2, %v1407_v16  ;;  %v3053_v22 = vmul.f32 -1.442695, %v4600_v17 }
 0x230   : > { %v3649_v23 = vpop.eup %3648  ;;  %v1356_v26 = vadd.f32 1.0, %v3647_v20 }
 0x231   : > { %v1412_v28 = vsel %vm1411_vm14, %v3645_v2, %v1408_v21  ;;  %v1420_v29 = vmul.f32 %v3649_v23, %v4590_v3  ;;  %3650 = vpow2.f32 %v3053_v22  ;;  %vm1425_vm0 = vweird.f32 %v3649_v23  ;;  %v3368_v21 = vld [vmem:[#allocation7 + $0x38] sm:$0xff]  ;;  %v3367_v22 = vld [vmem:[#allocation7 + $0x30] sm:$0xff] }
 0x232   : > { %v1417_v30 = vsel %vm1414_vm15, %v1416_v25, %v1412_v28  ;;  %3652 = vrcp.f32 %v1356_v26  ;;  %vm1426_vm2 = vmor %vm1424_vm1, %vm1425_vm0  ;;  %v1445_v44 = vand.u32 2147483648, %v1356_v26  ;;  %v1443_v47 = vand.u32 2147483647, %v1356_v26  ;;  %1820 = vmatpush.bf16.msrb.mxu3 %v3368_v21  ;;  %v4620_v25 = vld [vmem:[%s4895_s5] ss:$0 sm:$0xff] }
 0x233   : > { %v1482_v32 = vmul.f32 %v1417_v30, %v4579_v33  ;;  %v1421_v5 = vsub.f32 1.0, %v1420_v29  ;;  %v1428_v33 = vand.u32 2147483647, %v4590_v3  ;;  %vm1439_vm5 = vweird.f32 %v1356_v26  ;;  %v3363_v30 = vld [vmem:[#allocation7 + $0x10] sm:$0xff] }
 0x234   : > { %v1324_v18 = vpop.f32.mrf.mxu1  ;;  %v1446_v57 = vor.u32 1.1754944e-38, %v1445_v44  ;;  %vm1444_vm7 = vcmp.eq.f32.partialorder %v1443_v47, 8.507059e+37 }
 0x235   : > { %v1422_v34 = vmul.f32 %v3649_v23, %v1421_v5  ;;  %v4607_v35 = vadd.f32 %v4570_v10, %v1324_v18  ;;  %v1488_v36 = vpack.c.bf16 %v1482_v32, %v1481_v31  ;;  %vm1429_vm4 = vcmp.eq.f32.partialorder %v1428_v33, 8.507059e+37  ;;  %v3362_v31 = vld [vmem:[#allocation7 + $0x8] sm:$0xff] }
 0x236   : > { %1821 = vmatpush.bf16.msrb.mxu3 %v3367_v22 }
 0x237   : > { %v3651_v37 = vpop.eup %3650  ;;  %v3054_v38 = vmul.f32 -1.442695, %v4607_v35  ;;  %1572 = vmatmul.bf16.gmra.mxu2 %v1488_v36  ;;  %v1423_v42 = vadd.f32 %v3649_v23, %v1422_v34 }
 0x238   : > { %v3653_v39 = vpop.eup %3652  ;;  %v1357_v40 = vadd.f32 1.0, %v3651_v37 }
 0x239   : > { %v1435_v43 = vmul.f32 %v3653_v39, %v1356_v26  ;;  %3654 = vpow2.f32 %v3054_v38  ;;  %v1427_v41 = vsel %vm1426_vm2, %v3649_v23, %v1423_v42  ;;  %vm1440_vm3 = vweird.f32 %v3653_v39  ;;  %v3366_v23 = vld [vmem:[#allocation7 + $0x28] sm:$0xff]  ;;  %v3364_v26 = vld [vmem:[#allocation7 + $0x18] sm:$0xff] }
 0x23a   : > { %3656 = vrcp.f32 %v1357_v40  ;;  %v1432_v55 = vsel %vm1429_vm4, %v1431_v48, %v1427_v41  ;;  %vm1441_vm6 = vmor %vm1439_vm5, %vm1440_vm3  ;;  %v1460_v3 = vand.u32 2147483648, %v1357_v40  ;;  %vm1454_vm9 = vweird.f32 %v1357_v40  ;;  %1822 = vmatpush.bf16.msrb.mxu3 %v3366_v23 }
 0x23b   : > { %v1436_v10 = vsub.f32 1.0, %v1435_v43  ;;  %v1483_v8 = vmul.f32 %v1432_v55, %v4583_v52  ;;  %v1458_v4 = vand.u32 2147483647, %v1357_v40 }
 0x23c   : > { %v1461_v46 = vor.u32 1.1754944e-38, %v1460_v3 }
 0x23d   : > { %v1437_v45 = vmul.f32 %v3653_v39, %v1436_v10  ;;  %vm1459_vm12 = vcmp.eq.f32.partialorder %v1458_v4, 8.507059e+37 }
 0x23e   : > { %1823 = vmatpush.bf16.msrb.mxu3 %v3365_v24 }
 0x23f   : > { %v3655_v49 = vpop.eup %3654  ;;  %v1438_v50 = vadd.f32 %v3653_v39, %v1437_v45 }
 0x240   : > { %v3657_v54 = vpop.eup %3656  ;;  %v1358_v58 = vadd.f32 1.0, %v3655_v49 }
 0x241   : > { %v1442_v59 = vsel %vm1441_vm6, %v3653_v39, %v1438_v50  ;;  %v1450_v56 = vmul.f32 %v3657_v54, %v1357_v40  ;;  %vm1455_vm8 = vweird.f32 %v3657_v54 }
 0x242   : > { %v1447_v6 = vsel %vm1444_vm7, %v1446_v57, %v1442_v59  ;;  %3658 = vrcp.f32 %v1358_v58  ;;  %vm1456_vm10 = vmor %vm1454_vm9, %vm1455_vm8  ;;  %v1475_v9 = vand.u32 2147483648, %v1358_v58  ;;  %v1473_v52 = vand.u32 2147483647, %v1358_v58  ;;  %1824 = vmatpush.bf16.msrb.mxu3 %v3364_v26 }
 0x243   : > { %v1484_v60 = vmul.f32 %v1447_v6, %v4587_v63  ;;  %v1451_v53 = vsub.f32 1.0, %v1450_v56  ;;  %vm1469_vm13 = vweird.f32 %v1358_v58 }
 0x244   : > { %v1476_v13 = vor.u32 1.1754944e-38, %v1475_v9  ;;  %vm1474_vm15 = vcmp.eq.f32.partialorder %v1473_v52, 8.507059e+37 }
 0x245   : > { %v1452_v61 = vmul.f32 %v3657_v54, %v1451_v53  ;;  %v1489_v62 = vpack.c.bf16 %v1484_v60, %v1483_v8 }
 0x246   : > { %1825 = vmatpush.bf16.msrb.mxu3 %v3363_v30 }
 0x247   : > { %1577 = vmatmul.bf16.gmra.mxu2 %v1489_v62  ;;  %v1453_v1 = vadd.f32 %v3657_v54, %v1452_v61 }
 0x248   : > { %v3659_v0 = vpop.eup %3658 }
 0x249   : > { %v1465_v2 = vmul.f32 %v3659_v0, %v1358_v58  ;;  %v1457_v11 = vsel %vm1456_vm10, %v3657_v54, %v1453_v1  ;;  %vm1470_vm11 = vweird.f32 %v3659_v0 }
 0x24a   : > { %v1462_v51 = vsel %vm1459_vm12, %v1461_v46, %v1457_v11  ;;  %vm1471_vm14 = vmor %vm1469_vm13, %vm1470_vm11  ;;  %1826 = vmatpush.bf16.msrb.mxu3 %v3362_v31 }
 0x24b   : > { %v1466_v7 = vsub.f32 1.0, %v1465_v2  ;;  %v1485_v16 = vmul.f32 %v1462_v51, %v4600_v17 }
 0x24d   : > { %v1467_v12 = vmul.f32 %v3659_v0, %v1466_v7 }
 0x24f   : > { %v1468_v63 = vadd.f32 %v3659_v0, %v1467_v12 }
 0x251   : > { %v1472_v14 = vsel %vm1471_vm14, %v3659_v0, %v1468_v63 }
 0x252   : > { %v1477_v15 = vsel %vm1474_vm15, %v1476_v13, %v1472_v14 }
 0x253   : > { %v1486_v19 = vmul.f32 %v1477_v15, %v4607_v35  ;;  %v3361_v35 = vld [vmem:[#allocation7] sm:$0xff] }
 0x254   : > { %1827 = vmatpush.bf16.msrb.mxu3 %v3361_v35 }
 0x255   : > { %v1490_v20 = vpack.c.bf16 %v1486_v19, %v1485_v16 }
 0x257   : > { %1582 = vmatmul.bf16.gmra.mxu2 %v1490_v20 }
 0x2a8   : > { %v1568_v28 = vpop.f32.mrf.mxu2 }
 0x2a9   : > { %v1569_v17 = vadd.f32 %v4620_v25, %v1568_v28 }
 0x2ab   : > { %v3087_v29 = vmul.f32 -1.442695, %v1569_v17 }
 0x2ad   : > { %3660 = vpow2.f32 %v3087_v29 }
 0x2b0   : > { %v1570_v32 = vpop.f32.mrf.mxu2 }
 0x2b1   : > { %v1571_v5 = vadd.f32 %v4620_v25, %v1570_v32 }
 0x2b3   : > { %v3661_v18 = vpop.eup %3660  ;;  %v3088_v34 = vmul.f32 -1.442695, %v1571_v5 }
 0x2b4   : > { %v1612_v36 = vadd.f32 1.0, %v3661_v18 }
 0x2b5   : > { %3662 = vpow2.f32 %v3088_v34 }
 0x2b6   : > { %3664 = vrcp.f32 %v1612_v36  ;;  %v1631_v49 = vand.u32 2147483648, %v1612_v36  ;;  %vm1625_vm1 = vweird.f32 %v1612_v36  ;;  %v1629_v54 = vand.u32 2147483647, %v1612_v36 }
 0x2b8   : > { %v1632_v60 = vor.u32 1.1754944e-38, %v1631_v49  ;;  %vm1630_vm4 = vcmp.eq.f32.partialorder %v1629_v54, 8.507059e+37 }
 0x2ba   : > { %v1573_v40 = vpop.f32.mrf.mxu2 }
 0x2bb   : > { %v3663_v37 = vpop.eup %3662  ;;  %v4625_v43 = vadd.f32 %v4620_v25, %v1573_v40 }
 0x2bc   : > { %v3665_v38 = vpop.eup %3664  ;;  %v1613_v39 = vadd.f32 1.0, %v3663_v37 }
 0x2bd   : > { %v1621_v42 = vmul.f32 %v3665_v38, %v1612_v36  ;;  %v3089_v33 = vmul.f32 -1.442695, %v4625_v43  ;;  %vm1626_vm0 = vweird.f32 %v3665_v38 }
 0x2be   : > { %3666 = vrcp.f32 %v1613_v39  ;;  %vm1627_vm2 = vmor %vm1625_vm1, %vm1626_vm0  ;;  %v1644_v58 = vand.u32 2147483647, %v1613_v39  ;;  %v1646_v59 = vand.u32 2147483648, %v1613_v39  ;;  %vm1640_vm5 = vweird.f32 %v1613_v39 }
 0x2bf   : > { %v1622_v27 = vsub.f32 1.0, %v1621_v42  ;;  %3668 = vpow2.f32 %v3089_v33 }
 0x2c0   : > { %v1647_v62 = vor.u32 1.1754944e-38, %v1646_v59  ;;  %vm1645_vm7 = vcmp.eq.f32.partialorder %v1644_v58, 8.507059e+37 }
 0x2c1   : > { %v1623_v10 = vmul.f32 %v3665_v38, %v1622_v27 }
 0x2c2   : > { %v1575_v41 = vpop.f32.mrf.mxu2 }
 0x2c3   : > { %v1624_v45 = vadd.f32 %v3665_v38, %v1623_v10  ;;  %v4629_v48 = vadd.f32 %v4620_v25, %v1575_v41 }
 0x2c4   : > { %v3667_v44 = vpop.eup %3666 }
 0x2c5   : > { %v1636_v47 = vmul.f32 %v3667_v44, %v1613_v39  ;;  %v3669_v50 = vpop.eup %3668  ;;  %v3090_v57 = vmul.f32 -1.442695, %v4629_v48  ;;  %v1628_v6 = vsel %vm1627_vm2, %v3665_v38, %v1624_v45  ;;  %vm1641_vm3 = vweird.f32 %v3667_v44 }
 0x2c6   : > { %v1614_v56 = vadd.f32 1.0, %v3669_v50  ;;  %v1633_v61 = vsel %vm1630_vm4, %v1632_v60, %v1628_v6  ;;  %vm1642_vm6 = vmor %vm1640_vm5, %vm1641_vm3 }
 0x2c7   : > { %v1637_v55 = vsub.f32 1.0, %v1636_v47  ;;  %3670 = vpow2.f32 %v3090_v57  ;;  %v1740_v7 = vmul.f32 %v1633_v61, %v1569_v17 }
 0x2c8   : > { %3672 = vrcp.f32 %v1614_v56  ;;  %v1661_v24 = vand.u32 2147483648, %v1614_v56  ;;  %vm1655_vm9 = vweird.f32 %v1614_v56  ;;  %v1659_v26 = vand.u32 2147483647, %v1614_v56 }
 0x2c9   : > { %v1638_v8 = vmul.f32 %v3667_v44, %v1637_v55 }
 0x2ca   : > { %v1578_v0 = vpop.f32.mrf.mxu2  ;;  %v1662_v34 = vor.u32 1.1754944e-38, %v1661_v24  ;;  %vm1660_vm12 = vcmp.eq.f32.partialorder %v1659_v26, 8.507059e+37 }
 0x2cb   : > { %v1639_v53 = vadd.f32 %v3667_v44, %v1638_v8  ;;  %v4633_v2 = vadd.f32 %v4620_v25, %v1578_v0 }
 0x2cd   : > { %v1643_v1 = vsel %vm1642_vm6, %v3667_v44, %v1639_v53  ;;  %v3671_v4 = vpop.eup %3670  ;;  %v3091_v11 = vmul.f32 -1.442695, %v4633_v2 }
 0x2ce   : > { %v1648_v3 = vsel %vm1645_vm7, %v1647_v62, %v1643_v1  ;;  %v3673_v12 = vpop.eup %3672  ;;  %v1615_v52 = vadd.f32 1.0, %v3671_v4 }
 0x2cf   : > { %v1741_v9 = vmul.f32 %v1648_v3, %v1571_v5  ;;  %v1651_v46 = vmul.f32 %v3673_v12, %v1614_v56  ;;  %3674 = vpow2.f32 %v3091_v11  ;;  %vm1656_vm8 = vweird.f32 %v3673_v12 }
 0x2d0   : > { %3676 = vrcp.f32 %v1615_v52  ;;  %vm4643_vm10 = vmor %vm1655_vm9, %vm1656_vm8  ;;  %v1674_v29 = vand.u32 2147483647, %v1615_v52  ;;  %v1676_v30 = vand.u32 2147483648, %v1615_v52  ;;  %vm1670_vm13 = vweird.f32 %v1615_v52 }
 0x2d1   : > { %v1748_v63 = vpack.c.bf16 %v1741_v9, %v1740_v7  ;;  %v1652_v51 = vsub.f32 1.0, %v1651_v46 }
 0x2d2   : > { %v1580_v13 = vpop.f32.mrf.mxu2  ;;  %v1677_v40 = vor.u32 1.1754944e-38, %v1676_v30  ;;  %vm1675_vm15 = vcmp.eq.f32.partialorder %v1674_v29, 8.507059e+37 }
 0x2d3   : > { %1828 = vmatmul.bf16.vlgmr.msrb.gmra.mxu3 %v1748_v63  ;;  %v1653_v14 = vmul.f32 %v3673_v12, %v1652_v51  ;;  %v4637_v15 = vadd.f32 %v4620_v25, %v1580_v13 }
 0x2d5   : > { %v3675_v16 = vpop.eup %3674  ;;  %v3092_v19 = vmul.f32 -1.442695, %v4637_v15  ;;  %v1654_v22 = vadd.f32 %v3673_v12, %v1653_v14 }
 0x2d6   : > { %v3677_v20 = vpop.eup %3676  ;;  %v4640_v21 = vadd.f32 1.0, %v3675_v16 }
 0x2d7   : > { %v1666_v23 = vmul.f32 %v3677_v20, %v1615_v52  ;;  %3678 = vpow2.f32 %v3092_v19  ;;  %v1658_v32 = vsel %vm4643_vm10, %v3673_v12, %v1654_v22  ;;  %vm1671_vm11 = vweird.f32 %v3677_v20 }
 0x2d8   : > { %3680 = vrcp.f32 %v4640_v21  ;;  %v1663_v39 = vsel %vm1660_vm12, %v1662_v34, %v1658_v32  ;;  %vm1672_vm14 = vmor %vm1670_vm13, %vm1671_vm11  ;;  %vm1685_vm1 = vweird.f32 %v4640_v21 }
 0x2d9   : > { %v1667_v28 = vsub.f32 1.0, %v1666_v23  ;;  %v1742_v44 = vmul.f32 %v1663_v39, %v4625_v43  ;;  %v1691_v43 = vand.u32 2147483648, %v4640_v21  ;;  %v3373_v39 = vld [vmem:[#allocation8 + $0x20] sm:$0xff] }
 0x2da   : > { %v1583_v31 = vpop.f32.mrf.mxu2 }
 0x2db   : > { %v1668_v5 = vmul.f32 %v3677_v20, %v1667_v28  ;;  %v4650_v18 = vadd.f32 %v4620_v25, %v1583_v31  ;;  %v1692_v62 = vor.u32 1.1754944e-38, %v1691_v43 }
 0x2dd   : > { %v3679_v35 = vpop.eup %3678  ;;  %v1669_v36 = vadd.f32 %v3677_v20, %v1668_v5  ;;  %v3093_v37 = vmul.f32 -1.442695, %v4650_v18 }
 0x2de   : > { %v3681_v38 = vpop.eup %3680  ;;  %v1617_v42 = vadd.f32 1.0, %v3679_v35 }
 0x2df   : > { %v1673_v27 = vsel %vm1672_vm14, %v3677_v20, %v1669_v36  ;;  %v1681_v33 = vmul.f32 %v3681_v38, %v4640_v21  ;;  %3682 = vpow2.f32 %v3093_v37  ;;  %vm1686_vm0 = vweird.f32 %v3681_v38  ;;  %v3376_v36 = vld [vmem:[#allocation8 + $0x38] sm:$0xff]  ;;  %v3375_v37 = vld [vmem:[#allocation8 + $0x30] sm:$0xff] }
 0x2e0   : > { %v1678_v10 = vsel %vm1675_vm15, %v1677_v40, %v1673_v27  ;;  %3684 = vrcp.f32 %v1617_v42  ;;  %vm1687_vm2 = vmor %vm1685_vm1, %vm1686_vm0  ;;  %v1706_v8 = vand.u32 2147483648, %v1617_v42  ;;  %v1704_v61 = vand.u32 2147483647, %v1617_v42  ;;  %2081 = vmatpush.bf16.msrb.mxu0 %v3376_v36  ;;  %v4670_v40 = vld [vmem:[%s4827_s9] ss:$0 sm:$0xff] }
 0x2e1   : > { %v1743_v41 = vmul.f32 %v1678_v10, %v4629_v48  ;;  %v1682_v45 = vsub.f32 1.0, %v1681_v33  ;;  %v1689_v48 = vand.u32 2147483647, %v4640_v21  ;;  %vm1700_vm5 = vweird.f32 %v1617_v42  ;;  %v3371_v10 = vld [vmem:[#allocation8 + $0x10] sm:$0xff] }
 0x2e2   : > { %v1585_v47 = vpop.f32.mrf.mxu2  ;;  %v1707_v7 = vor.u32 1.1754944e-38, %v1706_v8  ;;  %vm1705_vm7 = vcmp.eq.f32.partialorder %v1704_v61, 8.507059e+37 }
 0x2e3   : > { %v1683_v49 = vmul.f32 %v3681_v38, %v1682_v45  ;;  %v4657_v50 = vadd.f32 %v4620_v25, %v1585_v47  ;;  %v1749_v54 = vpack.c.bf16 %v1743_v41, %v1742_v44  ;;  %vm1690_vm4 = vcmp.eq.f32.partialorder %v1689_v48, 8.507059e+37  ;;  %v3370_v44 = vld [vmem:[#allocation8 + $0x8] sm:$0xff] }
 0x2e4   : > { %2082 = vmatpush.bf16.msrb.mxu0 %v3375_v37 }
 0x2e5   : > { %v3683_v55 = vpop.eup %3682  ;;  %v3094_v57 = vmul.f32 -1.442695, %v4657_v50  ;;  %1833 = vmatmul.bf16.gmra.mxu3 %v1749_v54  ;;  %v1684_v56 = vadd.f32 %v3681_v38, %v1683_v49 }
 0x2e6   : > { %v3685_v58 = vpop.eup %3684  ;;  %v1618_v59 = vadd.f32 1.0, %v3683_v55 }
 0x2e7   : > { %v1696_v6 = vmul.f32 %v3685_v58, %v1617_v42  ;;  %3686 = vpow2.f32 %v3094_v57  ;;  %v1688_v60 = vsel %vm1687_vm2, %v3681_v38, %v1684_v56  ;;  %vm1701_vm3 = vweird.f32 %v3685_v58  ;;  %v3374_v38 = vld [vmem:[#allocation8 + $0x28] sm:$0xff]  ;;  %v3372_v42 = vld [vmem:[#allocation8 + $0x18] sm:$0xff] }
 0x2e8   : > { %3688 = vrcp.f32 %v1618_v59  ;;  %v1693_v4 = vsel %vm1690_vm4, %v1692_v62, %v1688_v60  ;;  %vm1702_vm6 = vmor %vm1700_vm5, %vm1701_vm3  ;;  %v1721_v21 = vand.u32 2147483648, %v1618_v59  ;;  %vm1715_vm9 = vweird.f32 %v1618_v59  ;;  %2083 = vmatpush.bf16.msrb.mxu0 %v3374_v38 }
 0x2e9   : > { %v1697_v25 = vsub.f32 1.0, %v1696_v6  ;;  %v1744_v46 = vmul.f32 %v1693_v4, %v4633_v2  ;;  %v1719_v22 = vand.u32 2147483647, %v1618_v59 }
 0x2ea   : > { %v1722_v17 = vor.u32 1.1754944e-38, %v1721_v21 }
 0x2eb   : > { %v1698_v53 = vmul.f32 %v3685_v58, %v1697_v25  ;;  %vm1720_vm12 = vcmp.eq.f32.partialorder %v1719_v22, 8.507059e+37 }
 0x2ec   : > { %2084 = vmatpush.bf16.msrb.mxu0 %v3373_v39 }
 0x2ed   : > { %v3687_v0 = vpop.eup %3686  ;;  %v1699_v1 = vadd.f32 %v3685_v58, %v1698_v53 }
 0x2ee   : > { %v3689_v3 = vpop.eup %3688  ;;  %v1619_v9 = vadd.f32 1.0, %v3687_v0 }
 0x2ef   : > { %v1703_v11 = vsel %vm1702_vm6, %v3685_v58, %v1699_v1  ;;  %v1711_v12 = vmul.f32 %v3689_v3, %v1618_v59  ;;  %vm1716_vm8 = vweird.f32 %v3689_v3 }
 0x2f0   : > { %v1708_v52 = vsel %vm1705_vm7, %v1707_v7, %v1703_v11  ;;  %3690 = vrcp.f32 %v1619_v9  ;;  %vm1717_vm10 = vmor %vm1715_vm9, %vm1716_vm8  ;;  %v1736_v24 = vand.u32 2147483648, %v1619_v9  ;;  %v1734_v2 = vand.u32 2147483647, %v1619_v9  ;;  %2085 = vmatpush.bf16.msrb.mxu0 %v3372_v42 }
 0x2f1   : > { %v1745_v63 = vmul.f32 %v1708_v52, %v4637_v15  ;;  %v1712_v51 = vsub.f32 1.0, %v1711_v12  ;;  %vm1730_vm13 = vweird.f32 %v1619_v9 }
 0x2f2   : > { %v1737_v30 = vor.u32 1.1754944e-38, %v1736_v24  ;;  %vm1735_vm15 = vcmp.eq.f32.partialorder %v1734_v2, 8.507059e+37 }
 0x2f3   : > { %v1713_v13 = vmul.f32 %v3689_v3, %v1712_v51  ;;  %v1750_v14 = vpack.c.bf16 %v1745_v63, %v1744_v46 }
 0x2f4   : > { %2086 = vmatpush.bf16.msrb.mxu0 %v3371_v10 }
 0x2f5   : > { %1838 = vmatmul.bf16.gmra.mxu3 %v1750_v14  ;;  %v1714_v19 = vadd.f32 %v3689_v3, %v1713_v13 }
 0x2f6   : > { %v3691_v16 = vpop.eup %3690 }
 0x2f7   : > { %v1726_v20 = vmul.f32 %v3691_v16, %v1619_v9  ;;  %v1718_v26 = vsel %vm1717_vm10, %v3689_v3, %v1714_v19  ;;  %vm1731_vm11 = vweird.f32 %v3691_v16 }
 0x2f8   : > { %v1723_v29 = vsel %vm1720_vm12, %v1722_v17, %v1718_v26  ;;  %vm1732_vm14 = vmor %vm1730_vm13, %vm1731_vm11  ;;  %2087 = vmatpush.bf16.msrb.mxu0 %v3370_v44 }
 0x2f9   : > { %v1727_v23 = vsub.f32 1.0, %v1726_v20  ;;  %v1746_v5 = vmul.f32 %v1723_v29, %v4650_v18 }
 0x2fb   : > { %v1728_v28 = vmul.f32 %v3691_v16, %v1727_v23 }
 0x2fd   : > { %v1729_v15 = vadd.f32 %v3691_v16, %v1728_v28 }
 0x2ff   : > { %v1733_v31 = vsel %vm1732_vm14, %v3691_v16, %v1729_v15 }
 0x300   : > { %v1738_v32 = vsel %vm1735_vm15, %v1737_v30, %v1733_v31 }
 0x301   : > { %v1747_v34 = vmul.f32 %v1738_v32, %v4657_v50  ;;  %v3369_v50 = vld [vmem:[#allocation8] sm:$0xff] }
 0x302   : > { %2088 = vmatpush.bf16.msrb.mxu0 %v3369_v50 }
 0x303   : > { %v1751_v35 = vpack.c.bf16 %v1747_v34, %v1746_v5 }
 0x305   : > { %1843 = vmatmul.bf16.gmra.mxu3 %v1751_v35 }
 0x356   : > { %v1829_v27 = vpop.f32.mrf.mxu3 }
 0x357   : > { %v1830_v18 = vadd.f32 %v4670_v40, %v1829_v27 }
 0x359   : > { %v3127_v33 = vmul.f32 -1.442695, %v1830_v18 }
 0x35b   : > { %3692 = vpow2.f32 %v3127_v33 }
 0x35e   : > { %v1831_v41 = vpop.f32.mrf.mxu3 }
 0x35f   : > { %v1832_v45 = vadd.f32 %v4670_v40, %v1831_v41 }
 0x361   : > { %v3693_v47 = vpop.eup %3692  ;;  %v3128_v49 = vmul.f32 -1.442695, %v1832_v45 }
 0x362   : > { %v1873_v54 = vadd.f32 1.0, %v3693_v47 }
 0x363   : > { %3694 = vpow2.f32 %v3128_v49 }
 0x364   : > { %3696 = vrcp.f32 %v1873_v54  ;;  %v1892_v0 = vand.u32 2147483648, %v1873_v54  ;;  %vm1886_vm1 = vweird.f32 %v1873_v54  ;;  %v1890_v3 = vand.u32 2147483647, %v1873_v54 }
 0x366   : > { %v1893_v63 = vor.u32 1.1754944e-38, %v1892_v0  ;;  %vm1891_vm4 = vcmp.eq.f32.partialorder %v1890_v3, 8.507059e+37 }
 0x368   : > { %v1834_v59 = vpop.f32.mrf.mxu3 }
 0x369   : > { %v3695_v55 = vpop.eup %3694  ;;  %v4675_v6 = vadd.f32 %v4670_v40, %v1834_v59 }
 0x36a   : > { %v3697_v57 = vpop.eup %3696  ;;  %v1874_v58 = vadd.f32 1.0, %v3695_v55 }
 0x36b   : > { %v1882_v56 = vmul.f32 %v3697_v57, %v1873_v54  ;;  %v3129_v48 = vmul.f32 -1.442695, %v4675_v6  ;;  %vm1887_vm0 = vweird.f32 %v3697_v57 }
 0x36c   : > { %3698 = vrcp.f32 %v1874_v58  ;;  %vm1888_vm2 = vmor %vm1886_vm1, %vm1887_vm0  ;;  %v1905_v9 = vand.u32 2147483647, %v1874_v58  ;;  %v1907_v11 = vand.u32 2147483648, %v1874_v58  ;;  %vm1901_vm5 = vweird.f32 %v1874_v58 }
 0x36d   : > { %v1883_v43 = vsub.f32 1.0, %v1882_v56  ;;  %3700 = vpow2.f32 %v3129_v48 }
 0x36e   : > { %v1908_v14 = vor.u32 1.1754944e-38, %v1907_v11  ;;  %vm1906_vm7 = vcmp.eq.f32.partialorder %v1905_v9, 8.507059e+37 }
 0x36f   : > { %v1884_v25 = vmul.f32 %v3697_v57, %v1883_v43 }
 0x370   : > { %v1836_v60 = vpop.f32.mrf.mxu3 }
 0x371   : > { %v1885_v53 = vadd.f32 %v3697_v57, %v1884_v25  ;;  %v4679_v62 = vadd.f32 %v4670_v40, %v1836_v60 }
 0x372   : > { %v3699_v8 = vpop.eup %3698 }
 0x373   : > { %v1897_v61 = vmul.f32 %v3699_v8, %v1874_v58  ;;  %v3701_v1 = vpop.eup %3700  ;;  %v3130_v7 = vmul.f32 -1.442695, %v4679_v62  ;;  %v1889_v52 = vsel %vm1888_vm2, %v3697_v57, %v1885_v53  ;;  %vm1902_vm3 = vweird.f32 %v3699_v8 }
 0x374   : > { %v1875_v12 = vadd.f32 1.0, %v3701_v1  ;;  %v1894_v13 = vsel %vm1891_vm4, %v1893_v63, %v1889_v52  ;;  %vm1903_vm6 = vmor %vm1901_vm5, %vm1902_vm3 }
 0x375   : > { %v1898_v4 = vsub.f32 1.0, %v1897_v61  ;;  %3702 = vpow2.f32 %v3130_v7  ;;  %v2001_v23 = vmul.f32 %v1894_v13, %v1830_v18 }
 0x376   : > { %3704 = vrcp.f32 %v1875_v12  ;;  %v1922_v39 = vand.u32 2147483648, %v1875_v12  ;;  %vm1916_vm9 = vweird.f32 %v1875_v12  ;;  %v1920_v42 = vand.u32 2147483647, %v1875_v12 }
 0x377   : > { %v1899_v46 = vmul.f32 %v3699_v8, %v1898_v4 }
 0x378   : > { %v1839_v16 = vpop.f32.mrf.mxu3  ;;  %v1923_v49 = vor.u32 1.1754944e-38, %v1922_v39  ;;  %vm1921_vm12 = vcmp.eq.f32.partialorder %v1920_v42, 8.507059e+37 }
 0x379   : > { %v1900_v51 = vadd.f32 %v3699_v8, %v1899_v46  ;;  %v4683_v20 = vadd.f32 %v4670_v40, %v1839_v16 }
 0x37b   : > { %v1904_v19 = vsel %vm1903_vm6, %v3699_v8, %v1900_v51  ;;  %v3703_v22 = vpop.eup %3702  ;;  %v3131_v26 = vmul.f32 -1.442695, %v4683_v20 }
 0x37c   : > { %v1909_v21 = vsel %vm1906_vm7, %v1908_v14, %v1904_v19  ;;  %v3705_v28 = vpop.eup %3704  ;;  %v1876_v2 = vadd.f32 1.0, %v3703_v22 }
 0x37d   : > { %v2002_v24 = vmul.f32 %v1909_v21, %v1832_v45  ;;  %v1912_v17 = vmul.f32 %v3705_v28, %v1875_v12  ;;  %3706 = vpow2.f32 %v3131_v26  ;;  %vm1917_vm8 = vweird.f32 %v3705_v28 }
 0x37e   : > { %3708 = vrcp.f32 %v1876_v2  ;;  %vm4693_vm10 = vmor %vm1916_vm9, %vm1917_vm8  ;;  %v1935_v33 = vand.u32 2147483647, %v1876_v2  ;;  %v1937_v10 = vand.u32 2147483648, %v1876_v2  ;;  %vm1931_vm13 = vweird.f32 %v1876_v2 }
 0x37f   : > { %v2009_v15 = vpack.c.bf16 %v2002_v24, %v2001_v23  ;;  %v1913_v29 = vsub.f32 1.0, %v1912_v17 }
 0x380   : > { %v1841_v30 = vpop.f32.mrf.mxu3  ;;  %v1938_v59 = vor.u32 1.1754944e-38, %v1937_v10  ;;  %vm1936_vm15 = vcmp.eq.f32.partialorder %v1935_v33, 8.507059e+37 }
 0x381   : > { %2089 = vmatmul.bf16.vlgmr.msrb.gmra.mxu0 %v2009_v15  ;;  %v1914_v31 = vmul.f32 %v3705_v28, %v1913_v29  ;;  %v4687_v32 = vadd.f32 %v4670_v40, %v1841_v30 }
 0x383   : > { %v3707_v5 = vpop.eup %3706  ;;  %v3132_v34 = vmul.f32 -1.442695, %v4687_v32  ;;  %v1915_v37 = vadd.f32 %v3705_v28, %v1914_v31 }
 0x384   : > { %v3709_v35 = vpop.eup %3708  ;;  %v4690_v36 = vadd.f32 1.0, %v3707_v5 }
 0x385   : > { %v1927_v38 = vmul.f32 %v3709_v35, %v1876_v2  ;;  %3710 = vpow2.f32 %v3132_v34  ;;  %v1919_v41 = vsel %vm4693_vm10, %v3705_v28, %v1915_v37  ;;  %vm1932_vm11 = vweird.f32 %v3709_v35 }
 0x386   : > { %3712 = vrcp.f32 %v4690_v36  ;;  %v1924_v58 = vsel %vm1921_vm12, %v1923_v49, %v1919_v41  ;;  %vm1933_vm14 = vmor %vm1931_vm13, %vm1932_vm11  ;;  %vm1946_vm1 = vweird.f32 %v4690_v36 }
 0x387   : > { %v1928_v27 = vsub.f32 1.0, %v1927_v38  ;;  %v2003_v8 = vmul.f32 %v1924_v58, %v4675_v6  ;;  %v1952_v6 = vand.u32 2147483648, %v4690_v36  ;;  %v3383_v58 = vld [vmem:[#allocation10 + $0x30] sm:$0xff] }
 0x388   : > { %v1844_v44 = vpop.f32.mrf.mxu3 }
 0x389   : > { %v1929_v45 = vmul.f32 %v3709_v35, %v1928_v27  ;;  %v4700_v47 = vadd.f32 %v4670_v40, %v1844_v44  ;;  %v1953_v14 = vor.u32 1.1754944e-38, %v1952_v6 }
 0x38b   : > { %v3711_v50 = vpop.eup %3710  ;;  %v1930_v54 = vadd.f32 %v3709_v35, %v1929_v45  ;;  %v3133_v55 = vmul.f32 -1.442695, %v4700_v47 }
 0x38c   : > { %v3713_v57 = vpop.eup %3712  ;;  %v1878_v56 = vadd.f32 1.0, %v3711_v50 }
 0x38d   : > { %v1934_v43 = vsel %vm1933_vm14, %v3709_v35, %v1930_v54  ;;  %v1942_v48 = vmul.f32 %v3713_v57, %v4690_v36  ;;  %3714 = vpow2.f32 %v3133_v55  ;;  %vm1947_vm0 = vweird.f32 %v3713_v57  ;;  %v3384_v55 = vld [vmem:[#allocation10 + $0x38] sm:$0xff] }
 0x38e   : > { %v1939_v25 = vsel %vm1936_vm15, %v1938_v59, %v1934_v43  ;;  %3716 = vrcp.f32 %v1878_v56  ;;  %vm1948_vm2 = vmor %vm1946_vm1, %vm1947_vm0  ;;  %v1967_v46 = vand.u32 2147483648, %v1878_v56  ;;  %v1965_v13 = vand.u32 2147483647, %v1878_v56  ;;  %2298 = vmatpush.bf16.msrb.mxu1 %v3384_v55 }
 0x38f   : > { %v2004_v60 = vmul.f32 %v1939_v25, %v4679_v62  ;;  %v1943_v53 = vsub.f32 1.0, %v1942_v48  ;;  %v1950_v62 = vand.u32 2147483647, %v4690_v36  ;;  %vm1961_vm5 = vweird.f32 %v1878_v56  ;;  %v4720_v48 = vld [vmem:[%s4829_s11] ss:$0 sm:$0xff] }
 0x390   : > { %v1846_v61 = vpop.f32.mrf.mxu3  ;;  %v1968_v23 = vor.u32 1.1754944e-38, %v1967_v46  ;;  %vm1966_vm7 = vcmp.eq.f32.partialorder %v1965_v13, 8.507059e+37  ;;  %vm2181_vm1 = vcmask 1041409  }
 0x391   : > { %v1944_v0 = vmul.f32 %v3713_v57, %v1943_v53  ;;  %v4707_v1 = vadd.f32 %v4670_v40, %v1846_v61  ;;  %v2010_v3 = vpack.c.bf16 %v2004_v60, %v2003_v8  ;;  %vm1951_vm4 = vcmp.eq.f32.partialorder %v1950_v62, 8.507059e+37 }
 0x392   : > { %2299 = vmatpush.bf16.msrb.mxu1 %v3383_v58  ;;  %v4140_v8 = vmov 8.0  }
 0x393   : > { %v3715_v4 = vpop.eup %3714  ;;  %v3134_v7 = vmul.f32 -1.442695, %v4707_v1  ;;  %2094 = vmatmul.bf16.gmra.mxu0 %v2010_v3  ;;  %v1945_v12 = vadd.f32 %v3713_v57, %v1944_v0  ;;  %v3380_v0 = vld [vmem:[#allocation10 + $0x18] sm:$0xff] }
 0x394   : > { %v3717_v9 = vpop.eup %3716  ;;  %v1879_v11 = vadd.f32 1.0, %v3715_v4 }
 0x395   : > { %v1957_v52 = vmul.f32 %v3717_v9, %v1878_v56  ;;  %3718 = vpow2.f32 %v3134_v7  ;;  %v1949_v63 = vsel %vm1948_vm2, %v3713_v57, %v1945_v12  ;;  %vm1962_vm3 = vweird.f32 %v3717_v9  ;;  %v3382_v56 = vld [vmem:[#allocation10 + $0x28] sm:$0xff]  ;;  %v3379_v12 = vld [vmem:[#allocation10 + $0x10] sm:$0xff] }
 0x396   : > { %3720 = vrcp.f32 %v1879_v11  ;;  %v1954_v22 = vsel %vm1951_vm4, %v1953_v14, %v1949_v63  ;;  %vm1963_vm6 = vmor %vm1961_vm5, %vm1962_vm3  ;;  %v1982_v36 = vand.u32 2147483648, %v1879_v11  ;;  %vm1976_vm9 = vweird.f32 %v1879_v11  ;;  %2300 = vmatpush.bf16.msrb.mxu1 %v3382_v56  ;;  %v3378_v63 = vld [vmem:[#allocation10 + $0x8] sm:$0xff] }
 0x397   : > { %v1958_v40 = vsub.f32 1.0, %v1957_v52  ;;  %v2005_v17 = vmul.f32 %v1954_v22, %v4683_v20  ;;  %v1980_v37 = vand.u32 2147483647, %v1879_v11  ;;  %v3377_v22 = vld [vmem:[#allocation10] sm:$0xff]  ;;  %vm2183_vm2 = vcmask 1042434  }
 0x398   : > { %v1983_v18 = vor.u32 1.1754944e-38, %v1982_v36  ;;  %v3392_v36 = vld [vmem:[#allocation11 + $0x38] sm:$0xff]  ;;  %vm2185_vm3 = vcmask 1043459   ;;  %vm2187_vm4 = vcmask 1044484   ;;  %vm2189_vm5 = vcmask 1045509  }
 0x399   : > { %v1959_v51 = vmul.f32 %v3717_v9, %v1958_v40  ;;  %vm1981_vm12 = vcmp.eq.f32.partialorder %v1980_v37, 8.507059e+37  ;;  %2400 = vmatpush.bf16.msrb.mxu2 %v3392_v36 }
 0x39b   : > { %v3719_v16 = vpop.eup %3718  ;;  %v1960_v19 = vadd.f32 %v3717_v9, %v1959_v51 }
 0x39c   : > { %v3721_v21 = vpop.eup %3720  ;;  %v1880_v24 = vadd.f32 1.0, %v3719_v16 }
 0x39d   : > { %v1964_v26 = vsel %vm1963_vm6, %v3717_v9, %v1960_v19  ;;  %v1972_v28 = vmul.f32 %v3721_v21, %v1879_v11  ;;  %vm1977_vm8 = vweird.f32 %v3721_v21  ;;  %vm2191_vm6 = vcmask 1046534  }
 0x39e   : > { %v1969_v2 = vsel %vm1966_vm7, %v1968_v23, %v1964_v26  ;;  %3722 = vrcp.f32 %v1880_v24  ;;  %vm1978_vm10 = vmor %vm1976_vm9, %vm1977_vm8  ;;  %v1997_v39 = vand.u32 2147483648, %v1880_v24  ;;  %v1995_v20 = vand.u32 2147483647, %v1880_v24 }
 0x39f   : > { %v2006_v15 = vmul.f32 %v1969_v2, %v4687_v32  ;;  %v1973_v29 = vsub.f32 1.0, %v1972_v28  ;;  %vm1991_vm13 = vweird.f32 %v1880_v24  ;;  %3724 = vrcp.f32 %v4140_v8 }
 0x3a0   : > { %v1998_v10 = vor.u32 1.1754944e-38, %v1997_v39  ;;  %vm1996_vm15 = vcmp.eq.f32.partialorder %v1995_v20, 8.507059e+37  ;;  %vm2193_vm7 = vcmask 1047559  }
 0x3a1   : > { %v1974_v30 = vmul.f32 %v3721_v21, %v1973_v29  ;;  %v2011_v31 = vpack.c.bf16 %v2006_v15, %v2005_v17 }
 0x3a3   : > { %2099 = vmatmul.bf16.gmra.mxu0 %v2011_v31  ;;  %v1975_v34 = vadd.f32 %v3721_v21, %v1974_v30 }
 0x3a4   : > { %v3723_v5 = vpop.eup %3722 }
 0x3a5   : > { %v1987_v35 = vmul.f32 %v3723_v5, %v1880_v24  ;;  %v1979_v42 = vsel %vm1978_vm10, %v3721_v21, %v1975_v34  ;;  %vm1992_vm11 = vweird.f32 %v3723_v5  ;;  %v3725_v9 = vpop.eup %3724 }
 0x3a6   : > { %v1984_v33 = vsel %vm1981_vm12, %v1983_v18, %v1979_v42  ;;  %vm1993_vm14 = vmor %vm1991_vm13, %vm1992_vm11  ;;  %v2159_v40 = vmul.f32 8.0, %v3725_v9  ;;  %vm2163_vm0 = vweird.f32 %v3725_v9 }
 0x3a7   : > { %v1988_v38 = vsub.f32 1.0, %v1987_v35  ;;  %v2007_v45 = vmul.f32 %v1984_v33, %v4700_v47  ;;  %v3381_v47 = vld [vmem:[#allocation10 + $0x20] sm:$0xff] }
 0x3a8   : > { %2301 = vmatpush.bf16.msrb.mxu1 %v3381_v47  ;;  %v2160_v23 = vsub.f32 1.0, %v2159_v40 }
 0x3a9   : > { %v1989_v27 = vmul.f32 %v3723_v5, %v1988_v38 }
 0x3aa   : > { %v2161_v30 = vmul.f32 %v3725_v9, %v2160_v23 }
 0x3ab   : > { %v1990_v32 = vadd.f32 %v3723_v5, %v1989_v27  ;;  %v3391_v27 = vld [vmem:[#allocation11 + $0x30] sm:$0xff] }
 0x3ac   : > { %2302 = vmatpush.bf16.msrb.mxu1 %v3380_v0  ;;  %v2162_v20 = vadd.f32 %v3725_v9, %v2161_v30  ;;  %2401 = vmatpush.bf16.msrb.mxu2 %v3391_v27 }
 0x3ad   : > { %v1994_v44 = vsel %vm1993_vm14, %v3723_v5, %v1990_v32 }
 0x3ae   : > { %v1999_v41 = vsel %vm1996_vm15, %v1998_v10, %v1994_v44 }
 0x3af   : > { %v2008_v49 = vmul.f32 %v1999_v41, %v4707_v1 }
 0x3b0   : > { %2303 = vmatpush.bf16.msrb.mxu1 %v3379_v12 }
 0x3b1   : > { %v2012_v50 = vpack.c.bf16 %v2008_v49, %v2007_v45 }
 0x3b3   : > { %2104 = vmatmul.bf16.gmra.mxu0 %v2012_v50  ;;  %v3390_v50 = vld [vmem:[#allocation11 + $0x28] sm:$0xff] }
 0x3b4   : > { %2304 = vmatpush.bf16.msrb.mxu1 %v3378_v63  ;;  %2402 = vmatpush.bf16.msrb.mxu2 %v3390_v50  ;;  %v3385_v50 = vld [vmem:[#allocation11] sm:$0xff] }
 0x3b8   : > { %2305 = vmatpush.bf16.msrb.mxu1 %v3377_v22 }
 0x3fe   : > { %v2090_v54 = vpop.f32.mrf.mxu0 }
 0x3ff   : > { %v2091_v25 = vadd.f32 %v4720_v48, %v2090_v54  ;;  %v2164_v54 = vsel %vm2163_vm0, %v3725_v9, %v2162_v20 }
 0x401   : > { %v2110_v3 = vrot.slane %v2091_v25, 4 }
 0x403   : > { %v2111_v6 = vadd.f32 %v2110_v3, %v2091_v25 }
 0x405   : > { %v2112_v19 = vrot.slane %v2111_v6, 2 }
 0x406   : > { %v2092_v57 = vpop.f32.mrf.mxu0 }
 0x407   : > { %v2093_v60 = vadd.f32 %v4720_v48, %v2092_v57  ;;  %v2113_v15 = vadd.f32 %v2112_v19, %v2111_v6 }
 0x409   : > { %v2116_v7 = vrot.slane %v2093_v60, 4  ;;  %v2114_v39 = vrot.slane %v2113_v15, 1 }
 0x40b   : > { %v2117_v46 = vadd.f32 %v2116_v7, %v2093_v60  ;;  %v2115_v45 = vadd.f32 %v2114_v39, %v2113_v15 }
 0x40d   : > { %v2118_v24 = vrot.slane %v2117_v46, 2  ;;  %v2165_v8 = vmul.f32 %v2164_v54, %v2115_v45  ;;  %v3386_v45 = vld [vmem:[#allocation11 + $0x8] sm:$0xff] }
 0x40f   : > { %v2119_v31 = vadd.f32 %v2118_v24, %v2117_v46  ;;  %v2197_v12 = vpack.c.bf16 %v2165_v8, %v2165_v8 }
 0x410   : > { %v2095_v59 = vpop.f32.mrf.mxu0 }
 0x411   : > { %v2096_v53 = vadd.f32 %v4720_v48, %v2095_v59  ;;  %v2120_v18 = vrot.slane %v2119_v31, 1 }
 0x413   : > { %v2122_v11 = vrot.slane %v2096_v53, 4  ;;  %v2121_v55 = vadd.f32 %v2120_v18, %v2119_v31 }
 0x415   : > { %v2123_v51 = vadd.f32 %v2122_v11, %v2096_v53  ;;  %v3389_v53 = vld [vmem:[#allocation11 + $0x20] sm:$0xff] }
 0x416   : > { %2403 = vmatpush.bf16.msrb.mxu2 %v3389_v53 }
 0x417   : > { %v2124_v28 = vrot.slane %v2123_v51, 2 }
 0x418   : > { %v2097_v43 = vpop.f32.mrf.mxu0 }
 0x419   : > { %v2098_v1 = vadd.f32 %v4720_v48, %v2097_v43  ;;  %v2125_v34 = vadd.f32 %v2124_v28, %v2123_v51 }
 0x41b   : > { %v2128_v52 = vrot.slane %v2098_v1, 4  ;;  %v2126_v10 = vrot.slane %v2125_v34, 1 }
 0x41d   : > { %v2129_v14 = vadd.f32 %v2128_v52, %v2098_v1  ;;  %v2127_v59 = vadd.f32 %v2126_v10, %v2125_v34 }
 0x41f   : > { %v2130_v2 = vrot.slane %v2129_v14, 2 }
 0x420   : > { %v2100_v61 = vpop.f32.mrf.mxu0 }
 0x421   : > { %v2101_v4 = vadd.f32 %v4720_v48, %v2100_v61  ;;  %v2131_v37 = vadd.f32 %v2130_v2, %v2129_v14  ;;  %v2166_v61 = vmul.f32 %v2164_v54, %v2121_v55 }
 0x423   : > { %v2134_v62 = vrot.slane %v2101_v4, 4  ;;  %v2132_v44 = vrot.slane %v2131_v37, 1  ;;  %v2198_v6 = vpack.c.bf16 %v2166_v61, %v2166_v61 }
 0x425   : > { %v2135_v21 = vadd.f32 %v2134_v62, %v2101_v4  ;;  %v2133_v43 = vadd.f32 %v2132_v44, %v2131_v37  ;;  %v2167_v4 = vmul.f32 %v2164_v54, %v2127_v59  ;;  %v2234_v19 = vunpack.c.l.b16 %v2198_v6  ;;  %v3388_v44 = vld [vmem:[#allocation11 + $0x18] sm:$0xff]  ;;  %v3399_v59 = vld [vmem:[#allocation13 + $0x30] sm:$0xff] }
 0x426   : > { %2404 = vmatpush.bf16.msrb.mxu2 %v3388_v44  ;;  %v3396_v6 = vld [vmem:[#allocation13 + $0x18] sm:$0xff] }
 0x427   : > { %v2136_v29 = vrot.slane %v2135_v21, 2  ;;  %v2168_v7 = vmul.f32 %v2164_v54, %v2133_v43  ;;  %v3398_v43 = vld [vmem:[#allocation13 + $0x28] sm:$0xff] }
 0x428   : > { %v2102_v13 = vpop.f32.mrf.mxu0 }
 0x429   : > { %v2103_v16 = vadd.f32 %v4720_v48, %v2102_v13  ;;  %v2137_v42 = vadd.f32 %v2136_v29, %v2135_v21  ;;  %v2200_v63 = vpack.c.bf16 %v2168_v7, %v2168_v7  ;;  %v2233_v13 = vunpack.c.l.b16 %v2197_v12 }
 0x42b   : > { %v2140_v26 = vrot.slane %v2103_v16, 4  ;;  %v2138_v49 = vrot.slane %v2137_v42, 1  ;;  %v2236_v2 = vunpack.c.l.b16 %v2200_v63  ;;  %v2241_v30 = vsel %vm2181_vm1, %v2234_v19, %v2233_v13 }
 0x42d   : > { %v2141_v17 = vadd.f32 %v2140_v26, %v2103_v16  ;;  %v2139_v60 = vadd.f32 %v2138_v49, %v2137_v42  ;;  %v2182_v16 = vsel %vm2181_vm1, %v2166_v61, %v2165_v8  ;;  %v3591_v49 = vld [vmem:[%s4831_s13] ss:$0 sm:$0xff] }
 0x42e   : > { %v2184_v23 = vsel %vm2183_vm2, %v2167_v4, %v2182_v16  ;;  %v3397_v8 = vld [vmem:[#allocation13 + $0x20] sm:$0xff] }
 0x42f   : > { %v2142_v5 = vrot.slane %v2141_v17, 2  ;;  %v2169_v52 = vmul.f32 %v2164_v54, %v2139_v60  ;;  %v2186_v28 = vsel %vm2185_vm3, %v2168_v7, %v2184_v23 }
 0x430   : > { %v2105_v35 = vpop.f32.mrf.mxu0 }
 0x431   : > { %v2106_v38 = vadd.f32 %v4720_v48, %v2105_v35  ;;  %v2143_v32 = vadd.f32 %v2142_v5, %v2141_v17  ;;  %v2201_v14 = vpack.c.bf16 %v2169_v52, %v2169_v52  ;;  %v2188_v15 = vsel %vm2187_vm4, %v2169_v52, %v2186_v28 }
 0x433   : > { %v2146_v33 = vrot.slane %v2106_v38, 4  ;;  %v2144_v57 = vrot.slane %v2143_v32, 1  ;;  %v2237_v29 = vunpack.c.l.b16 %v2201_v14 }
 0x435   : > { %v2147_v41 = vadd.f32 %v2146_v33, %v2106_v38  ;;  %v2145_v0 = vadd.f32 %v2144_v57, %v2143_v32 }
 0x437   : > { %v2148_v58 = vrot.slane %v2147_v41, 2  ;;  %v2170_v62 = vmul.f32 %v2164_v54, %v2145_v0 }
 0x438   : > { %v2107_v56 = vpop.f32.mrf.mxu0 }
 0x439   : > { %v2149_v47 = vadd.f32 %v2148_v58, %v2147_v41  ;;  %v2108_v25 = vadd.f32 %v4720_v48, %v2107_v56  ;;  %v2199_v48 = vpack.c.bf16 %v2167_v4, %v2167_v4  ;;  %v2202_v21 = vpack.c.bf16 %v2170_v62, %v2170_v62  ;;  %v3387_v41 = vld [vmem:[#allocation11 + $0x10] sm:$0xff]  ;;  %v3400_v58 = vld [vmem:[#allocation13 + $0x38] sm:$0xff] }
 0x43a   : > { %v2190_v34 = vsel %vm2189_vm5, %v2170_v62, %v2188_v15  ;;  %2405 = vmatpush.bf16.msrb.mxu2 %v3387_v41  ;;  %2502 = vmatpush.bf16.msra.mxu3 %v3400_v58  ;;  %v3395_v62 = vld [vmem:[#allocation13 + $0x10] sm:$0xff] }
 0x43b   : > { %v2150_v1 = vrot.slane %v2149_v47, 1  ;;  %v2152_v3 = vrot.slane %v2108_v25, 4  ;;  %v2235_v24 = vunpack.c.l.b16 %v2199_v48  ;;  %v2238_v31 = vunpack.c.l.b16 %v2202_v21  ;;  %v3592_v48 = vld [vmem:[%s4833_s15] ss:$0 sm:$0xff] }
 0x43d   : > { %v2151_v9 = vadd.f32 %v2150_v1, %v2149_v47  ;;  %v2153_v11 = vadd.f32 %v2152_v3, %v2108_v25  ;;  %v2242_v36 = vsel %vm2183_vm2, %v2235_v24, %v2241_v30 }
 0x43e   : > { %v2243_v39 = vsel %vm2185_vm3, %v2236_v2, %v2242_v36  ;;  %2406 = vmatpush.bf16.msrb.mxu2 %v3386_v45  ;;  %2503 = vmatpush.bf16.msra.mxu3 %v3399_v59  ;;  %v3405_v36 = vld [vmem:[#allocation14 + $0x20] sm:$0xff] }
 0x43f   : > { %v2154_v40 = vrot.slane %v2153_v11, 2  ;;  %v2171_v46 = vmul.f32 %v2164_v54, %v2151_v9  ;;  %v2244_v27 = vsel %vm2187_vm4, %v2237_v29, %v2243_v39  ;;  %v3402_v39 = vld [vmem:[#allocation14 + $0x8] sm:$0xff] }
 0x440   : > { %v2245_v18 = vsel %vm2189_vm5, %v2238_v31, %v2244_v27  ;;  %v3401_v27 = vld [vmem:[#allocation14] sm:$0xff] }
 0x441   : > { %v2155_v51 = vadd.f32 %v2154_v40, %v2153_v11  ;;  %v2203_v26 = vpack.c.bf16 %v2171_v46, %v2171_v46  ;;  %v2192_v37 = vsel %vm2191_vm6, %v2171_v46, %v2190_v34  ;;  %v3394_v40 = vld [vmem:[#allocation13 + $0x8] sm:$0xff]  ;;  %v3393_v46 = vld [vmem:[#allocation13] sm:$0xff]  ;;  %v3407_v34 = vld [vmem:[#allocation14 + $0x30] sm:$0xff] }
 0x442   : > { %2407 = vmatpush.bf16.msrb.mxu2 %v3385_v50  ;;  %2504 = vmatpush.bf16.msra.mxu3 %v3398_v43 }
 0x443   : > { %v2156_v22 = vrot.slane %v2155_v51, 1  ;;  %v2239_v35 = vunpack.c.l.b16 %v2203_v26 }
 0x445   : > { %v2157_v17 = vadd.f32 %v2156_v22, %v2155_v51  ;;  %v2246_v32 = vsel %vm2191_vm6, %v2239_v35, %v2245_v18  ;;  %v3406_v35 = vld [vmem:[#allocation14 + $0x28] sm:$0xff] }
 0x446   : > { %2505 = vmatpush.bf16.msra.mxu3 %v3397_v8  ;;  %v3415_v8 = vld [vmem:[#allocation16 + $0x30] sm:$0xff] }
 0x447   : > { %v2172_v5 = vmul.f32 %v2164_v54, %v2157_v17 }
 0x449   : > { %v2204_v38 = vpack.c.bf16 %v2172_v5, %v2172_v5  ;;  %v2194_v42 = vsel %vm2193_vm7, %v2172_v5, %v2192_v37  ;;  %v3408_v5 = vld [vmem:[#allocation14 + $0x38] sm:$0xff] }
 0x44a   : > { %2196 = vst [vmem:[%s4747_s10] sm:$0xff] %v2194_v42  ;;  %2506 = vmatpush.bf16.msra.mxu3 %v3396_v6  ;;  %2604 = vmatpush.bf16.msra.mxu1 %v3408_v5  ;;  %v3404_v37 = vld [vmem:[#allocation14 + $0x18] sm:$0xff]  ;;  %v3593_v42 = vld [vmem:[%s4835_s17] ss:$0 sm:$0xff] }
 0x44b   : > { %v2240_v20 = vunpack.c.l.b16 %v2204_v38  ;;  %v3403_v38 = vld [vmem:[#allocation14 + $0x10] sm:$0xff] }
 0x44d   : > { %v2247_v33 = vsel %vm2193_vm7, %v2240_v20, %v2246_v32 }
 0x44e   : > { %v2248_v10 = vpack.c.b16 %v2247_v33, %v2247_v33  ;;  %2507 = vmatpush.bf16.msra.mxu3 %v3395_v62  ;;  %2605 = vmatpush.bf16.msra.mxu1 %v3407_v34 }
 0x450   : > { %2306 = vmatmul.bf16.vlgmr.msrb.gmra.mxu1 %v2248_v10 }
 0x452   : > { %2508 = vmatpush.bf16.msra.mxu3 %v3394_v40  ;;  %2606 = vmatpush.bf16.msra.mxu1 %v3406_v35 }
 0x456   : > { %2509 = vmatpush.bf16.msra.mxu3 %v3393_v46  ;;  %2607 = vmatpush.bf16.msra.mxu1 %v3405_v36 }
 0x45a   : > { %2608 = vmatpush.bf16.msra.mxu1 %v3404_v37 }
 0x45e   : > { %2609 = vmatpush.bf16.msra.mxu1 %v3403_v38 }
 0x462   : > { %2610 = vmatpush.bf16.msra.mxu1 %v3402_v39 }
 0x466   : > { %2611 = vmatpush.bf16.msra.mxu1 %v3401_v27 }
 0x4cd   : > { %v2307_v54 = vpop.f32.mrf.mxu1 }
 0x4ce   : > { %v2308_v55 = vadd.f32 %v3591_v49, %v2307_v54 }
 0x4d0   : > { %v3199_v57 = vmul.f32 -1.442695, %v2308_v55 }
 0x4d2   : > { %3726 = vpow2.f32 %v3199_v57 }
 0x4d5   : > { %v2309_v56 = vpop.f32.mrf.mxu1 }
 0x4d8   : > { %v3727_v47 = vpop.eup %3726 }
 0x4d9   : > { %v2314_v25 = vadd.f32 1.0, %v3727_v47 }
 0x4db   : > { %3728 = vrcp.f32 %v2314_v25  ;;  %v2326_v0 = vand.u32 2147483648, %v2314_v25  ;;  %v2324_v3 = vand.u32 2147483647, %v2314_v25  ;;  %vm2320_vm9 = vweird.f32 %v2314_v25 }
 0x4dd   : > { %v2327_v7 = vor.u32 1.1754944e-38, %v2326_v0  ;;  %vm2325_vm11 = vcmp.eq.f32.partialorder %v2324_v3, 8.507059e+37  ;;  %v3411_v0 = vld [vmem:[#allocation16 + $0x10] sm:$0xff]  ;;  %v3594_v3 = vld [vmem:[%s4837_s19] ss:$0 sm:$0xff] }
 0x4e1   : > { %v3729_v60 = vpop.eup %3728 }
 0x4e2   : > { %v2316_v53 = vmul.f32 %v3729_v60, %v2314_v25  ;;  %vm2321_vm8 = vweird.f32 %v3729_v60  ;;  %v3416_v25 = vld [vmem:[#allocation16 + $0x38] sm:$0xff] }
 0x4e3   : > { %vm2322_vm10 = vmor %vm2320_vm9, %vm2321_vm8  ;;  %2706 = vmatpush.bf16.msra.mxu2 %v3416_v25 }
 0x4e4   : > { %v2317_v61 = vsub.f32 1.0, %v2316_v53  ;;  %v3413_v53 = vld [vmem:[#allocation16 + $0x20] sm:$0xff] }
 0x4e6   : > { %v2318_v1 = vmul.f32 %v3729_v60, %v2317_v61  ;;  %v3412_v61 = vld [vmem:[#allocation16 + $0x18] sm:$0xff] }
 0x4e7   : > { %2707 = vmatpush.bf16.msra.mxu2 %v3415_v8 }
 0x4e8   : > { %v2319_v4 = vadd.f32 %v3729_v60, %v2318_v1  ;;  %v3410_v1 = vld [vmem:[#allocation16 + $0x8] sm:$0xff] }
 0x4ea   : > { %v2323_v9 = vsel %vm2322_vm10, %v3729_v60, %v2319_v4  ;;  %v3414_v60 = vld [vmem:[#allocation16 + $0x28] sm:$0xff]  ;;  %v3409_v4 = vld [vmem:[#allocation16] sm:$0xff] }
 0x4eb   : > { %v2328_v11 = vsel %vm2325_vm11, %v2327_v7, %v2323_v9  ;;  %2708 = vmatpush.bf16.msra.mxu2 %v3414_v60 }
 0x4ec   : > { %v2330_v12 = vmul.f32 %v2328_v11, %v2308_v55 }
 0x4ee   : > { %v2331_v52 = vpack.c.bf16 %v2330_v12, %v2330_v12 }
 0x4ef   : > { %2709 = vmatpush.bf16.msra.mxu2 %v3413_v53 }
 0x4f0   : > { %2408 = vmatmul.bf16.vlgmr.msrb.gmra.mxu2 %v2331_v52 }
 0x4f3   : > { %2710 = vmatpush.bf16.msra.mxu2 %v3412_v61 }
 0x4f7   : > { %2711 = vmatpush.bf16.msra.mxu2 %v3411_v0 }
 0x4fb   : > { %2712 = vmatpush.bf16.msra.mxu2 %v3410_v1 }
 0x4ff   : > { %2713 = vmatpush.bf16.msra.mxu2 %v3409_v4 }
 0x573   : > { %v2409_v63 = vpop.f32.mrf.mxu2 }
 0x574   : > { %v2410_v51 = vadd.f32 %v3592_v48, %v2409_v63 }
 0x576   : > { %v3232_v13 = vmul.f32 -1.442695, %v2410_v51 }
 0x578   : > { %3730 = vpow2.f32 %v3232_v13 }
 0x57b   : > { %v2411_v14 = vpop.f32.mrf.mxu2 }
 0x57e   : > { %v3731_v16 = vpop.eup %3730 }
 0x57f   : > { %v2416_v19 = vadd.f32 1.0, %v3731_v16 }
 0x581   : > { %3732 = vrcp.f32 %v2416_v19  ;;  %v2428_v24 = vand.u32 2147483648, %v2416_v19  ;;  %v2426_v28 = vand.u32 2147483647, %v2416_v19  ;;  %vm2422_vm13 = vweird.f32 %v2416_v19 }
 0x583   : > { %v2429_v17 = vor.u32 1.1754944e-38, %v2428_v24  ;;  %vm2427_vm15 = vcmp.eq.f32.partialorder %v2426_v28, 8.507059e+37 }
 0x587   : > { %v3733_v21 = vpop.eup %3732 }
 0x588   : > { %v2418_v22 = vmul.f32 %v3733_v21, %v2416_v19  ;;  %vm2423_vm12 = vweird.f32 %v3733_v21 }
 0x589   : > { %vm2424_vm14 = vmor %vm2422_vm13, %vm2423_vm12 }
 0x58a   : > { %v2419_v23 = vsub.f32 1.0, %v2418_v22 }
 0x58c   : > { %v2420_v26 = vmul.f32 %v3733_v21, %v2419_v23 }
 0x58e   : > { %v2421_v2 = vadd.f32 %v3733_v21, %v2420_v26 }
 0x590   : > { %v2425_v15 = vsel %vm2424_vm14, %v3733_v21, %v2421_v2 }
 0x591   : > { %v2430_v29 = vsel %vm2427_vm15, %v2429_v17, %v2425_v15 }
 0x592   : > { %v2432_v30 = vmul.f32 %v2430_v29, %v2410_v51 }
 0x594   : > { %v2433_v31 = vpack.c.bf16 %v2432_v30, %v2432_v30 }
 0x596   : > { %2510 = vmatmul.bf16.vlgmr.msra.gmra.mxu3 %v2433_v31 }
 0x619   : > { %v2511_v20 = vpop.f32.mrf.mxu3 }
 0x61a   : > { %v2512_v18 = vadd.f32 %v3593_v42, %v2511_v20 }
 0x61c   : > { %v3265_v32 = vmul.f32 -1.442695, %v2512_v18 }
 0x61e   : > { %3734 = vpow2.f32 %v3265_v32 }
 0x621   : > { %v2513_v33 = vpop.f32.mrf.mxu3 }
 0x624   : > { %v3735_v10 = vpop.eup %3734 }
 0x625   : > { %v2518_v44 = vadd.f32 1.0, %v3735_v10 }
 0x627   : > { %3736 = vrcp.f32 %v2518_v44  ;;  %v2530_v50 = vand.u32 2147483648, %v2518_v44  ;;  %v2528_v55 = vand.u32 2147483647, %v2518_v44  ;;  %vm2524_vm1 = vweird.f32 %v2518_v44 }
 0x629   : > { %v2531_v58 = vor.u32 1.1754944e-38, %v2530_v50  ;;  %vm2529_vm3 = vcmp.eq.f32.partialorder %v2528_v55, 8.507059e+37 }
 0x62d   : > { %v3737_v41 = vpop.eup %3736 }
 0x62e   : > { %v2520_v45 = vmul.f32 %v3737_v41, %v2518_v44  ;;  %vm2525_vm0 = vweird.f32 %v3737_v41 }
 0x62f   : > { %vm2526_vm2 = vmor %vm2524_vm1, %vm2525_vm0 }
 0x630   : > { %v2521_v49 = vsub.f32 1.0, %v2520_v45 }
 0x632   : > { %v2522_v54 = vmul.f32 %v3737_v41, %v2521_v49 }
 0x634   : > { %v2523_v57 = vadd.f32 %v3737_v41, %v2522_v54 }
 0x636   : > { %v2527_v59 = vsel %vm2526_vm2, %v3737_v41, %v2523_v57 }
 0x637   : > { %v2532_v56 = vsel %vm2529_vm3, %v2531_v58, %v2527_v59 }
 0x638   : > { %v2534_v43 = vmul.f32 %v2532_v56, %v2512_v18 }
 0x63a   : > { %v2535_v47 = vpack.c.bf16 %v2534_v43, %v2534_v43 }
 0x63c   : > { %2612 = vmatmul.bf16.vlgmr.msra.gmra.mxu1 %v2535_v47 }
 0x6b9   : > { %v2613_v7 = vpop.f32.mrf.mxu1 }
 0x6ba   : > { %v2614_v9 = vadd.f32 %v3594_v3, %v2613_v7 }
 0x6bc   : > { %v3298_v11 = vmul.f32 -1.442695, %v2614_v9 }
 0x6be   : > { %3738 = vpow2.f32 %v3298_v11 }
 0x6c1   : > { %v2615_v12 = vpop.f32.mrf.mxu1 }
 0x6c4   : > { %v3739_v52 = vpop.eup %3738 }
 0x6c5   : > { %v2620_v6 = vadd.f32 1.0, %v3739_v52 }
 0x6c7   : > { %3740 = vrcp.f32 %v2620_v6  ;;  %v2632_v46 = vand.u32 2147483648, %v2620_v6  ;;  %v2630_v51 = vand.u32 2147483647, %v2620_v6  ;;  %vm2626_vm5 = vweird.f32 %v2620_v6 }
 0x6c9   : > { %v2633_v14 = vor.u32 1.1754944e-38, %v2632_v46  ;;  %vm2631_vm7 = vcmp.eq.f32.partialorder %v2630_v51, 8.507059e+37 }
 0x6cd   : > { %v3741_v62 = vpop.eup %3740 }
 0x6ce   : > { %v2622_v40 = vmul.f32 %v3741_v62, %v2620_v6  ;;  %vm2627_vm4 = vweird.f32 %v3741_v62 }
 0x6cf   : > { %vm2628_vm6 = vmor %vm2626_vm5, %vm2627_vm4 }
 0x6d0   : > { %v2623_v48 = vsub.f32 1.0, %v2622_v40 }
 0x6d2   : > { %v2624_v63 = vmul.f32 %v3741_v62, %v2623_v48 }
 0x6d4   : > { %v2625_v13 = vadd.f32 %v3741_v62, %v2624_v63 }
 0x6d6   : > { %v2629_v16 = vsel %vm2628_vm6, %v3741_v62, %v2625_v13 }
 0x6d7   : > { %v2634_v19 = vsel %vm2631_vm7, %v2633_v14, %v2629_v16 }
 0x6d8   : > { %v2636_v21 = vmul.f32 %v2634_v19, %v2614_v9 }
 0x6da   : > { %v2637_v22 = vpack.c.bf16 %v2636_v21, %v2636_v21 }
 0x6dc   : > { %2714 = vmatmul.bf16.vlgmr.msra.gmra.mxu2 %v2637_v22 }
 0x6dd   : > { %4039 = shalt.err (!%p4036_p8)
}
 0x6de   : > { %3481 = dma.vmem_to_hbm [thread:$0]  (%p4299_p5), %s2753_s28, 128, %s2755_s29, %s2726_s1  }
 0x6df   : > { %s4901_s6 = sld [smem:[#allocation45_spill]]  ;;  %s4903_s14 = sshll.u32 %s4731_s25, 3 }
 0x6e0   : > { %s4902_s8 = sld [smem:[#allocation44_spill]]  ;;  %s873_s4 = scalar_lea.vmem [#allocation17], %s4903_s14 }
 0x6e1   : > { %s2738_s27 = sshll.u32 %s873_s4, 4  ;;  %s2721_s2 = scalar_lea.sflag [#allocation4], %s4731_s25  ;;  %s2739_s27 = int_to_ptr.vmem [resolvable:$true] %s2738_s27 }
 0x6e5   : > { %s2736_s24 = scalar_lea.hbm %s4901_s6, %s4417_s26 }
 0x6e6   : > { %v3595_v23 = vld [vmem:[%s4902_s8] ss:$0 sm:$0xff]  ;;  %s2740_s22 = sshll.u32 %s2736_s24, 4  ;;  %s4060_s8 = scalar_lea.hbm %s4901_s6, 16  ;;  %s2741_s22 = int_to_ptr.hbm [resolvable:$true] %s2740_s22 }
 0x6e7   : > { %s4054_s28 = sshra.s32 %s2741_s22, 4  ;;  %s4055_s28 = int_to_ptr.hbm [resolvable:$true] %s4054_s28 }
 0x6e8   : > { %s4056_s29 = scalar_lea.hbm %s4055_s28, 8  ;;  %p4061_p12 = scmp.lt.s32.totalorder %s4055_s28, %s4901_s6 }
 0x6e9   : > { %p4057_p9 = scmp.ne.s32.totalorder %s4055_s28, %s4056_s29  ;;  %p4062_p13 = scmp.lt.s32.totalorder %s4060_s8, %s4056_s29 }
 0x6eb   : > { %p4058_p10 = pnand %p4057_p9, %p4299_p5  ;;  %p4063_p0 = por %p4062_p13, %p4061_p12 }
 0x6ed   : > { %p4059_p11 = pneg %p4058_p10 }
 0x6ef   : > { %p4064_p1 = pnand %p4063_p0, %p4059_p11 }
 0x75f   : > { %v2715_v24 = vpop.f32.mrf.mxu2 }
 0x760   : > { %v2716_v26 = vadd.f32 %v3595_v23, %v2715_v24 }
 0x762   : > { %2719 = vst [vmem:[%s873_s4] sm:$0xff] %v2716_v26 }
 0x763   : > { %4067 = shalt.err (!%p4064_p1)
}
 0x764   : > { %3480 = dma.vmem_to_hbm [thread:$0]  (%p4299_p5), %s2739_s27, 128, %s2741_s22, %s2721_s2  }
 0x767   : > { %v2717_v28 = vpop.f32.mrf.mxu2 }
 0x768 PF: > { %s4904_s25 = sld [smem:[#allocation29_spill]] }
 0x769   : > { %s4905_s24 = sld [smem:[#allocation27_spill]] }
 0x76e   : > { %p3537_p2 = scmp.ge.s32.totalorder %s4904_s25, 2 }
 0x76f   : > { %s2766_s0 = sand.u32 1, %s4905_s24  }
 0x770   : > { %p3513_p3 = pnand %p3537_p2, %p4303_p6  ;;  %s2767_s14 = scalar_lea.sflag [#allocation4], %s2766_s0 }
 0x772   : > { %p3514_p4 = pneg %p3513_p3 }
 0x774   : > { %4105 = dma.done.wait (%p3514_p4), %s2767_s14, 128  }
 0x775   : > { %4107 = vsyncadd (%p3514_p4), %s2767_s14, 4294967168  ;;  %s2777_s4 = scalar_lea.sflag [#allocation19], %s2766_s0 }
 0x776   : > { %4109 = dma.done.wait (%p3514_p4), %s2777_s4, 128  }
 0x777   : > { %4111 = vsyncadd (%p3514_p4), %s2777_s4, 4294967168  ;;  %s4907_s25 = sld [smem:[#allocation30_spill]]  ;;  %s4910_s4 = smov %s4118_s30 }
 0x778   : > { %s4908_s7 = sld [smem:[#allocation28_spill]] }
 0x779   : > { %s4909_s24 = sld [smem:[#allocation31_spill]] }
 0x77d   : > { %p42_p5 = scmp.ge.s32.totalorder %s4907_s25, 4  }
 0x77e   : > { %s4911_s30 = smov %s4908_s7 }
 0x77f   :  { %44 = sbr.rel (!%p42_p5) target bundleno = 25 (0x19), region = 200 }
 0x784   :  { %2783 = vsyncpa [#allocation3], 1 }
 0x785   :  { %2785 = vsyncpa [#allocation3 + $0x1], 1 }
 0x786   :  { %2786 = vsyncpa [#allocation6], 1 }
 0x787   :  { %2787 = vsyncpa [#allocation9], 1 }
 0x788   :  { %2788 = vsyncpa [#allocation12], 1 }
 0x789   :  { %2789 = vsyncpa [#allocation15], 1 }
 0x78a   :  { %2790 = vsyncpa [#allocation4], 1 }
 0x78b   :  { %2792 = vsyncpa [#allocation4 + $0x1], 1 }
 0x78c   :  { %2793 = vsyncpa [#allocation19], 1 }
 0x78d   :  { %2795 = vsyncpa [#allocation19 + $0x1], 1 }

</bundles_post_ra>
